<compile_context>
chip_gen: v7x
topology: tpu7x:2x2x1
jax: 0.10.0
libtpu: 0.0.40
codegen_flags: <defaults>
</compile_context>

<pallas_src>
import math

import jax
import jax.numpy as jnp
from jax import lax
from jax.experimental import pallas as pl
from jax.experimental.pallas import tpu as pltpu

# ----------------------------- model config (small, synthetic) -----------------
B = 2            # batch
C = 4            # StateStackSize (channels)
IMG = 16         # PreProcHeight / width
PATCH = 8        # ViTlucidrains_patch_size
DIM = 32         # ViTlucidrains_dim == extracted_feature_embedding_dim
DEPTH = 2        # ViTlucidrains_depth
HEADS = 4        # ViTlucidrains_heads
DH = 8           # ViTlucidrains_dim_head  (HEADS * DH == DIM)
MLP_DIM = 64     # ViTlucidrains_mlp_dim
N_ACTIONS = 6    # output_size (DISCRETE)

N_PATCH = (IMG // PATCH) ** 2          # 4 patches
T = N_PATCH + 1                        # 5 real tokens (+1 CLS)
TOKP = 8                               # tokens padded to one sublane tile
BB = 2                                 # batch elements per grid block
ROWS_BLK = BB * TOKP                   # 16 padded token rows per grid block
PATCH_DIM = PATCH * PATCH * C          # 256
OUT_LANES = 128                        # lane-dense packed output width

# packed-slab geometry
W32_BLOCKS = DEPTH * 3 + 3             # per layer: W_qk, W_vo, W_mlp1 ; tail: head_w, h1_w, fin_wz
W32_ROWS = W32_BLOCKS * DIM            # 288
W64_BLOCKS = DEPTH + 1                 # per layer: W_mlp2 ; tail: W_comb
W64_ROWS = W64_BLOCKS * 2 * DIM        # 192
RV_ROWS = 3 + DEPTH * 5 + 3            # 16 bias / LN row-vectors

assert HEADS * DH == DIM
assert 2 * DIM + ROWS_BLK <= 128       # token-constant tile: cls_pos | row_mask | attn_mask
assert HEADS * DIM <= 128 and MLP_DIM <= 128 and 2 * HEADS * DH <= 128
assert N_ACTIONS + 2 <= OUT_LANES

_SQRT_2_OVER_PI = math.sqrt(2.0 / math.pi)
_TRANS_B = (((1,), (1,)), ((), ()))    # dot_general dims for q @ k^T


# ----------------------------- fused Pallas kernel ------------------------------

def _fused_forward_kernel(
    patches_ref,     # (ROWS_BLK, PATCH_DIM) f32  patchified pixels (0 on cls/pad rows)
    tok_ref,         # (ROWS_BLK, 128) f32        [cls+pos | row_mask | attn_mask]
    pw_ref,          # (PATCH_DIM, DIM) bf16      patch Linear (LN1 affine folded in)
    w32_ref,         # (W32_ROWS, 128) bf16       32-row weight slab
    w64_ref,         # (W64_ROWS, 128) bf16       64-row weight slab
    rv_ref,          # (RV_ROWS, 128) f32         bias / LN row-vector slab
    out_ref,         # (ROWS_BLK, OUT_LANES) f32  packed [policy | v_ext | v_int | 0...]
):
    f32 = jnp.float32
    bf16 = jnp.bfloat16

    def normalize(v, eps=1e-5):
        mu = jnp.mean(v, axis=-1, keepdims=True)
        vc = v - mu
        var = jnp.mean(vc * vc, axis=-1, keepdims=True)
        return vc * lax.rsqrt(var + eps)

    def gelu(v):
        # TODO(synk): tanh-approx GELU; PyTorch nn.GELU() default uses the exact erf form.
        return 0.5 * v * (1.0 + jnp.tanh(_SQRT_2_OVER_PI * (v + 0.044715 * v * v * v)))

    rvs = rv_ref[...]                                   # (RV_ROWS, 128) f32
    tok = tok_ref[...]                                  # (ROWS_BLK, 128) f32

    def rv(r, w):                                       # (1, w) bias / LN row
        return rvs[r:r + 1, :w]

    def w32(blk, w):                                    # (DIM, w) bf16 weight block
        return w32_ref[blk * DIM:(blk + 1) * DIM, :w]

    def w64(blk, w):                                    # (2*DIM, w) bf16 weight block
        return w64_ref[blk * 2 * DIM:(blk + 1) * 2 * DIM, :w]

    # ---------------- patch embedding: LN1(folded) -> Linear -> LN2 -------------
    pe = normalize(patches_ref[...])
    pe = jnp.dot(pe.astype(bf16), pw_ref[...], preferred_element_type=f32) + rv(0, DIM)
    pe = normalize(pe) * rv(1, DIM) + rv(2, DIM)        # (ROWS_BLK, DIM)

    cls_pos = tok[:, 0:DIM]                             # cls token + positional emb
    row_mask = tok[:, DIM:2 * DIM]                      # 1.0 on patch rows else 0.0
    attn_mask = tok[:, 2 * DIM:2 * DIM + ROWS_BLK]      # block-diag + key-pad additive mask

    x = pe * row_mask + cls_pos                         # (ROWS_BLK, DIM)
    scale = DH ** -0.5

    # ------------------------- transformer layers -------------------------------
    for li in range(DEPTH):
        rb = 3 + li * 5
        wb = li * 3

        # --- attention (pre-norm, residual); V and W_o algebraically folded ----
        hn = normalize(x) * rv(rb + 0, DIM) + rv(rb + 1, DIM)
        hn_b = hn.astype(bf16)
        qk = jnp.dot(hn_b, w32(wb + 0, 2 * HEADS * DH), preferred_element_type=f32)
        vo = jnp.dot(hn_b, w32(wb + 1, HEADS * DIM), preferred_element_type=f32)

        acc = jnp.zeros((ROWS_BLK, DIM), f32)
        for hd in range(HEADS):
            q = qk[:, hd * DH:(hd + 1) * DH]
            k = qk[:, HEADS * DH + hd * DH:HEADS * DH + (hd + 1) * DH]
            s = lax.dot_general(q, k, _TRANS_B, preferred_element_type=f32) * scale
            s = s + attn_mask                           # cross-batch & padded keys -> -1e9
            m = jnp.max(s, axis=-1, keepdims=True)
            p = jnp.exp(s - m)
            p = p * pl.reciprocal(jnp.sum(p, axis=-1, keepdims=True), approx=True)
            acc = acc + jnp.dot(p, vo[:, hd * DIM:(hd + 1) * DIM],
                                preferred_element_type=f32)
        x = x + acc + rv(rb + 2, DIM)

        # --- MLP (pre-norm, residual; LN2 affine folded into W_mlp1 / b_mlp1) --
        h = jnp.dot(normalize(x).astype(bf16), w32(wb + 2, MLP_DIM),
                    preferred_element_type=f32) + rv(rb + 3, MLP_DIM)
        h = gelu(h)
        h = jnp.dot(h.astype(bf16), w64(li, DIM),
                    preferred_element_type=f32) + rv(rb + 4, DIM)
        x = x + h

    # -------- final LN (folded into head_w), mlp_head, fused RL heads -----------
    # (heads are evaluated for all token rows; only CLS rows are read back)
    feat = jnp.dot(normalize(x).astype(bf16), w32(DEPTH * 3 + 0, DIM),
                   preferred_element_type=f32) + rv(3 + DEPTH * 5 + 0, DIM)
    feat_b = feat.astype(bf16)

    # h12 = [ relu(extra_layer(feat)) | relu(actor_fc1(feat)) ]
    h12 = jnp.maximum(
        jnp.dot(feat_b, w32(DEPTH * 3 + 1, 2 * DIM), preferred_element_type=f32)
        + rv(3 + DEPTH * 5 + 1, 2 * DIM), 0.0)

    # out = h12 @ [fin_wz; fin_wa] + feat @ fin_wz + fin_b
    #     = actor_hid @ actor_w2 + (extra + feat) @ [ce_w | ci_w] + biases
    out_ref[...] = (
        jnp.dot(h12.astype(bf16), w64(DEPTH, OUT_LANES), preferred_element_type=f32)
        + jnp.dot(feat_b, w32(DEPTH * 3 + 2, OUT_LANES), preferred_element_type=f32)
        + rv(3 + DEPTH * 5 + 2, OUT_LANES))


# ----------------------------- parameter init (deterministic, in-script) -------

def _normal_linear(key, in_f, out_f, std=0.02):
    kw, kb = jax.random.split(key)
    w = jax.random.normal(kw, (in_f, out_f), jnp.float32) * std
    b = jax.random.normal(kb, (out_f,), jnp.float32) * std
    return w, b


def _orthogonal_linear(key, in_f, out_f, gain):
    # matches torch.nn.init.orthogonal_(weight (out,in), gain) + zero bias
    w = jax.nn.initializers.orthogonal(scale=gain)(key, (out_f, in_f), jnp.float32)
    return w.T, jnp.zeros((out_f,), jnp.float32)


def init_params(key):
    keys = jax.random.split(key, 64)
    ki = iter(keys)
    p = {}

    # ViT patch embedding: LN(patch_dim) -> Linear(patch_dim, dim) -> LN(dim)
    p["patch_ln1_g"] = jnp.ones((PATCH_DIM,), jnp.float32)
    p["patch_ln1_b"] = jnp.zeros((PATCH_DIM,), jnp.float32)
    p["patch_w"], p["patch_b"] = _normal_linear(next(ki), PATCH_DIM, DIM)
    p["patch_ln2_g"] = jnp.ones((DIM,), jnp.float32)
    p["patch_ln2_b"] = jnp.zeros((DIM,), jnp.float32)

    p["cls"] = jax.random.normal(next(ki), (1, 1, DIM), jnp.float32) * 0.02
    p["pos"] = jax.random.normal(next(ki), (1, T, DIM), jnp.float32) * 0.02

    layers = []
    for _ in range(DEPTH):
        layer = {}
        layer["ln1_g"] = jnp.ones((DIM,), jnp.float32)
        layer["ln1_b"] = jnp.zeros((DIM,), jnp.float32)
        # to_qkv has no bias in lucidrains ViT
        layer["w_qkv"], _ = _normal_linear(next(ki), DIM, 3 * HEADS * DH)
        layer["w_o"], layer["b_o"] = _normal_linear(next(ki), HEADS * DH, DIM)
        layer["ln2_g"] = jnp.ones((DIM,), jnp.float32)
        layer["ln2_b"] = jnp.zeros((DIM,), jnp.float32)
        layer["w_mlp1"], layer["b_mlp1"] = _normal_linear(next(ki), DIM, MLP_DIM)
        layer["w_mlp2"], layer["b_mlp2"] = _normal_linear(next(ki), MLP_DIM, DIM)
        layers.append(layer)
    p["layers"] = layers

    p["ln_f_g"] = jnp.ones((DIM,), jnp.float32)
    p["ln_f_b"] = jnp.zeros((DIM,), jnp.float32)
    # mlp_head: Linear(dim, num_classes) with num_classes == dim (feature extractor)
    p["head_w"], p["head_b"] = _normal_linear(next(ki), DIM, DIM)

    # actor: Linear(dim, dim) -> ReLU -> Linear(dim, n_actions)  (orthogonal 0.01, zero bias)
    p["actor_w1"], p["actor_b1"] = _orthogonal_linear(next(ki), DIM, DIM, 0.01)
    p["actor_w2"], p["actor_b2"] = _orthogonal_linear(next(ki), DIM, N_ACTIONS, 0.01)
    # extra_layer: Linear(dim, dim) -> ReLU                      (orthogonal 0.1, zero bias)
    p["extra_w"], p["extra_b"] = _orthogonal_linear(next(ki), DIM, DIM, 0.1)
    # critics: Linear(dim, 1)                                    (orthogonal 0.01, zero bias)
    p["ce_w"], p["ce_b"] = _orthogonal_linear(next(ki), DIM, 1, 0.01)
    p["ci_w"], p["ci_b"] = _orthogonal_linear(next(ki), DIM, 1, 0.01)
    return p


# ----------------------------- one-time weight packing (hoisted off hot path) --

def prepare_packed_params(p):
    """All weight-derived packing, done ONCE (not inside the per-step jit)."""
    bf16 = jnp.bfloat16

    def pad_lanes(w, lanes=128):
        return jnp.pad(w.astype(jnp.float32), ((0, 0), (0, lanes - w.shape[1])))

    def rv_row(v):
        v = jnp.asarray(v, jnp.float32).reshape(-1)
        return jnp.pad(v, (0, 128 - v.shape[0]))

    # ---- token-constant tile: cls+pos | row_mask | block-diag attention mask ---
    tok_idx = jnp.arange(TOKP)
    row_mask_blk = ((tok_idx >= 1) & (tok_idx < T)).astype(jnp.float32)      # patch rows
    row_mask = jnp.broadcast_to(jnp.tile(row_mask_blk, (BB,))[:, None],
                                (ROWS_BLK, DIM))

    cls_pos_blk = jnp.zeros((TOKP, DIM), jnp.float32)
    cls_pos_blk = cls_pos_blk.at[:T, :].set(p["pos"][0])                     # + pos
    cls_pos_blk = cls_pos_blk.at[0, :].add(p["cls"][0, 0])                   # + cls token
    cls_pos = jnp.tile(cls_pos_blk, (BB, 1))                                 # (ROWS_BLK, DIM)

    ri = jnp.arange(ROWS_BLK)
    same_block = (ri[:, None] // TOKP) == (ri[None, :] // TOKP)
    key_real = (ri[None, :] % TOKP) < T
    attn_mask = jnp.where(same_block & key_real, 0.0, -1e9).astype(jnp.float32)

    tok_const = jnp.zeros((ROWS_BLK, 128), jnp.float32)
    tok_const = tok_const.at[:, :DIM].set(cls_pos)
    tok_const = tok_const.at[:, DIM:2 * DIM].set(row_mask)
    tok_const = tok_const.at[:, 2 * DIM:2 * DIM + ROWS_BLK].set(attn_mask)

    # ---- patch embedding Linear with LN1 affine folded in ----------------------
    pw = p["patch_ln1_g"][:, None] * p["patch_w"]
    pb = p["patch_b"] + p["patch_ln1_b"] @ p["patch_w"]

    rv_rows = [rv_row(pb), rv_row(p["patch_ln2_g"]), rv_row(p["patch_ln2_b"])]
    w32_blocks = []
    w64_blocks = []

    for layer in p["layers"]:
        w_qkv = layer["w_qkv"]                          # (DIM, 3*HEADS*DH)
        w_qk = w_qkv[:, :2 * HEADS * DH]                # (DIM, 64)   [q | k]
        w_v = w_qkv[:, 2 * HEADS * DH:]                 # (DIM, 32)
        w_o = layer["w_o"]                              # (32, 32)
        # algebraic fold: W_vo[:, hd*DIM:(hd+1)*DIM] = W_v_head @ W_o_head
        w_vo = jnp.concatenate(
            [w_v[:, hd * DH:(hd + 1) * DH] @ w_o[hd * DH:(hd + 1) * DH, :]
             for hd in range(HEADS)], axis=1)           # (DIM, HEADS*DIM = 128)
        # LN2 affine folded into mlp1
        w_mlp1 = layer["ln2_g"][:, None] * layer["w_mlp1"]
        b_mlp1 = layer["b_mlp1"] + layer["ln2_b"] @ layer["w_mlp1"]

        w32_blocks += [pad_lanes(w_qk), w_vo, pad_lanes(w_mlp1)]
        w64_blocks.append(pad_lanes(layer["w_mlp2"]))
        rv_rows += [rv_row(layer["ln1_g"]), rv_row(layer["ln1_b"]),
                    rv_row(layer["b_o"]), rv_row(b_mlp1), rv_row(layer["b_mlp2"])]

    # ---- final LN folded into mlp_head, fused RL head weights ------------------
    head_w = p["ln_f_g"][:, None] * p["head_w"]
    head_b = p["head_b"] + p["ln_f_b"] @ p["head_w"]

    h1_w = jnp.concatenate([p["extra_w"], p["actor_w1"]], axis=1)            # (DIM, 2*DIM)
    h1_b = jnp.concatenate([p["extra_b"], p["actor_b1"]], axis=0)            # (2*DIM,)

    fin_wa = jnp.zeros((DIM, OUT_LANES), jnp.float32).at[:, :N_ACTIONS].set(p["actor_w2"])
    fin_wz = (jnp.zeros((DIM, OUT_LANES), jnp.float32)
              .at[:, N_ACTIONS:N_ACTIONS + 1].set(p["ce_w"])
              .at[:, N_ACTIONS + 1:N_ACTIONS + 2].set(p["ci_w"]))
    fin_b = (jnp.zeros((OUT_LANES,), jnp.float32)
             .at[:N_ACTIONS].set(p["actor_b2"])
             .at[N_ACTIONS].set(p["ce_b"][0])
             .at[N_ACTIONS + 1].set(p["ci_b"][0]))
    w_comb = jnp.concatenate([fin_wz, fin_wa], axis=0)                       # (2*DIM, 128)

    w32_blocks += [pad_lanes(head_w), pad_lanes(h1_w), fin_wz]
    w64_blocks.append(w_comb)
    rv_rows += [rv_row(head_b), rv_row(h1_b), rv_row(fin_b)]

    w32_slab = jnp.concatenate(w32_blocks, axis=0).astype(bf16)              # (W32_ROWS, 128)
    w64_slab = jnp.concatenate(w64_blocks, axis=0).astype(bf16)              # (W64_ROWS, 128)
    rv_slab = jnp.stack(rv_rows, axis=0)                                     # (RV_ROWS, 128) f32

    assert w32_slab.shape == (W32_ROWS, 128)
    assert w64_slab.shape == (W64_ROWS, 128)
    assert rv_slab.shape == (RV_ROWS, 128)

    return (tok_const, pw.astype(bf16), w32_slab, w64_slab, rv_slab)


# ----------------------------- per-step forward (jitted) -----------------------

def cnn_actor_critic_forward(state, packed):
    """Returns (policy, value_ext, value_int) — DISCRETE, CLS-attention path."""
    b = state.shape[0]
    assert b % BB == 0, "batch must be a multiple of the per-block batch BB"

    # rearrange 'b c (h p1) (w p2) -> b (h w) (p1 p2 c)'
    patches = state.reshape(b, C, IMG // PATCH, PATCH, IMG // PATCH, PATCH)
    patches = jnp.transpose(patches, (0, 2, 4, 3, 5, 1)).reshape(b, N_PATCH, PATCH_DIM)
    # pad each batch block to TOKP rows: [cls slot, N_PATCH patches, zero pad]
    patches_padded = jnp.pad(
        patches, ((0, 0), (1, TOKP - 1 - N_PATCH), (0, 0))).reshape(b * TOKP, PATCH_DIM)

    tok_const, pw, w32_slab, w64_slab, rv_slab = packed
    grid = (b // BB,)

    out = pl.pallas_call(
        _fused_forward_kernel,
        grid=grid,
        in_specs=[
            pl.BlockSpec((ROWS_BLK, PATCH_DIM), lambda i: (i, 0)),
            pl.BlockSpec((ROWS_BLK, 128), lambda i: (0, 0)),
            pl.BlockSpec((PATCH_DIM, DIM), lambda i: (0, 0)),
            pl.BlockSpec((W32_ROWS, 128), lambda i: (0, 0)),
            pl.BlockSpec((W64_ROWS, 128), lambda i: (0, 0)),
            pl.BlockSpec((RV_ROWS, 128), lambda i: (0, 0)),
        ],
        out_specs=pl.BlockSpec((ROWS_BLK, OUT_LANES), lambda i: (i, 0)),
        out_shape=jax.ShapeDtypeStruct((b * TOKP, OUT_LANES), jnp.float32),
        compiler_params=pltpu.CompilerParams(dimension_semantics=("parallel",)),
    )(patches_padded, tok_const, pw, w32_slab, w64_slab, rv_slab)

    res = out[::TOKP]                                   # CLS rows only -> (b, OUT_LANES)
    policy = res[:, :N_ACTIONS]
    value_ext = res[:, N_ACTIONS:N_ACTIONS + 1]
    value_int = res[:, N_ACTIONS + 1:N_ACTIONS + 2]
    return policy, value_ext, value_int


# ----------------------------- main ---------------------------------------------

if __name__ == "__main__":
    key = jax.random.PRNGKey(0)
    k_state, k_params = jax.random.split(key)
    state = jax.random.normal(k_state, (B, C, IMG, IMG), jnp.float32)    # NCHW like PyTorch
    params = init_params(k_params)

    # one-time packing (hoisted out of the per-step hot path)
    packed = prepare_packed_params(params)
    jax.block_until_ready(packed)

    fwd = jax.jit(cnn_actor_critic_forward)
    policy, value_ext, value_int = fwd(state, packed)
    jax.block_until_ready((policy, value_ext, value_int))

    assert policy.shape == (B, N_ACTIONS)
    assert value_ext.shape == (B, 1)
    assert value_int.shape == (B, 1)
    assert bool(jnp.all(jnp.isfinite(policy)))
    assert bool(jnp.all(jnp.isfinite(value_ext)))
    assert bool(jnp.all(jnp.isfinite(value_int)))
    print("KERNEL_OK")
</pallas_src>

<mosaic_0001>
module attributes {stable_mosaic.version = 11 : i64} {
  func.func @_fused_forward_kernel(%arg0: i32, %arg1: memref<16x256xf32, #tpu.memory_space<vmem>>, %arg2: memref<16x128xf32, #tpu.memory_space<vmem>>, %arg3: memref<256x32xbf16, #tpu.memory_space<vmem>>, %arg4: memref<288x128xbf16, #tpu.memory_space<vmem>>, %arg5: memref<192x128xbf16, #tpu.memory_space<vmem>>, %arg6: memref<16x128xf32, #tpu.memory_space<vmem>>, %arg7: memref<16x128xf32, #tpu.memory_space<vmem>>) attributes {dimension_semantics = [#tpu.dimension_semantics<parallel>], iteration_bounds = array<i64: 1>, scalar_prefetch = 0 : i64, scratch_operands = 0 : i64, tpu.core_type = #tpu.core_type<tc>, window_params = [{transform_indices = @transform_0, window_bounds = array<i64: 16, 256>}, {pipeline_mode = #tpu.pipeline_mode<synchronous>, transform_indices = @transform_1, window_bounds = array<i64: 16, 128>}, {pipeline_mode = #tpu.pipeline_mode<synchronous>, transform_indices = @transform_2, window_bounds = array<i64: 256, 32>}, {pipeline_mode = #tpu.pipeline_mode<synchronous>, transform_indices = @transform_3, window_bounds = array<i64: 288, 128>}, {pipeline_mode = #tpu.pipeline_mode<synchronous>, transform_indices = @transform_4, window_bounds = array<i64: 192, 128>}, {pipeline_mode = #tpu.pipeline_mode<synchronous>, transform_indices = @transform_5, window_bounds = array<i64: 16, 128>}, {transform_indices = @transform_6, window_bounds = array<i64: 16, 128>}]} {
    %c0 = arith.constant 0 : index
    %c0_0 = arith.constant 0 : index
    %0 = vector.load %arg6[%c0, %c0_0] : memref<16x128xf32, #tpu.memory_space<vmem>>, vector<16x128xf32>
    %c0_1 = arith.constant 0 : index
    %c0_2 = arith.constant 0 : index
    %1 = vector.load %arg2[%c0_1, %c0_2] : memref<16x128xf32, #tpu.memory_space<vmem>>, vector<16x128xf32>
    %c0_3 = arith.constant 0 : index
    %c0_4 = arith.constant 0 : index
    %2 = vector.load %arg1[%c0_3, %c0_4] : memref<16x256xf32, #tpu.memory_space<vmem>>, vector<16x256xf32>
    %cst = arith.constant dense<0.000000e+00> : vector<16xf32>
    %3 = vector.multi_reduction <add>, %2, %cst [1] : vector<16x256xf32> to vector<16xf32>
    %4 = vector.shape_cast %3 : vector<16xf32> to vector<16x1xf32>
    %cst_5 = arith.constant 2.560000e+02 : f32
    %5 = vector.broadcast %cst_5 : f32 to vector<16x1xf32>
    %6 = arith.divf %4, %5 : vector<16x1xf32>
    %7 = vector.broadcast %6 : vector<16x1xf32> to vector<16x256xf32>
    %8 = arith.subf %2, %7 : vector<16x256xf32>
    %9 = arith.mulf %8, %8 : vector<16x256xf32>
    %cst_6 = arith.constant dense<0.000000e+00> : vector<16xf32>
    %10 = vector.multi_reduction <add>, %9, %cst_6 [1] : vector<16x256xf32> to vector<16xf32>
    %11 = vector.shape_cast %10 : vector<16xf32> to vector<16x1xf32>
    %cst_7 = arith.constant 2.560000e+02 : f32
    %12 = vector.broadcast %cst_7 : f32 to vector<16x1xf32>
    %13 = arith.divf %11, %12 : vector<16x1xf32>
    %cst_8 = arith.constant 9.99999974E-6 : f32
    %14 = vector.broadcast %cst_8 : f32 to vector<16x1xf32>
    %15 = arith.addf %13, %14 : vector<16x1xf32>
    %16 = math.rsqrt %15 : vector<16x1xf32>
    %17 = vector.broadcast %16 : vector<16x1xf32> to vector<16x256xf32>
    %18 = arith.mulf %8, %17 : vector<16x256xf32>
    %19 = arith.truncf %18 : vector<16x256xf32> to vector<16x256xbf16>
    %c0_9 = arith.constant 0 : index
    %c0_10 = arith.constant 0 : index
    %20 = vector.load %arg3[%c0_9, %c0_10] : memref<256x32xbf16, #tpu.memory_space<vmem>>, vector<256x32xbf16>
    %cst_11 = arith.constant dense<0.000000e+00> : vector<16x32xf32>
    %21 = tpu.matmul %19, %20, %cst_11 {dimension_numbers = #tpu.dot_dimension_numbers<[1], [0], [0], [1], [0, 0, 1, 1], [], []>} : vector<16x256xbf16>, vector<256x32xbf16>, vector<16x32xf32> -> vector<16x32xf32>
    %22 = vector.extract_strided_slice %0 {offsets = [0, 0], sizes = [1, 32], strides = [1, 1]} : vector<16x128xf32> to vector<1x32xf32>
    %23 = vector.broadcast %22 : vector<1x32xf32> to vector<16x32xf32>
    %24 = arith.addf %21, %23 : vector<16x32xf32>
    %cst_12 = arith.constant dense<0.000000e+00> : vector<16xf32>
    %25 = vector.multi_reduction <add>, %24, %cst_12 [1] : vector<16x32xf32> to vector<16xf32>
    %26 = vector.shape_cast %25 : vector<16xf32> to vector<16x1xf32>
    %cst_13 = arith.constant 3.200000e+01 : f32
    %27 = vector.broadcast %cst_13 : f32 to vector<16x1xf32>
    %28 = arith.divf %26, %27 : vector<16x1xf32>
    %29 = vector.broadcast %28 : vector<16x1xf32> to vector<16x32xf32>
    %30 = arith.subf %24, %29 : vector<16x32xf32>
    %31 = arith.mulf %30, %30 : vector<16x32xf32>
    %cst_14 = arith.constant dense<0.000000e+00> : vector<16xf32>
    %32 = vector.multi_reduction <add>, %31, %cst_14 [1] : vector<16x32xf32> to vector<16xf32>
    %33 = vector.shape_cast %32 : vector<16xf32> to vector<16x1xf32>
    %cst_15 = arith.constant 3.200000e+01 : f32
    %34 = vector.broadcast %cst_15 : f32 to vector<16x1xf32>
    %35 = arith.divf %33, %34 : vector<16x1xf32>
    %cst_16 = arith.constant 9.99999974E-6 : f32
    %36 = vector.broadcast %cst_16 : f32 to vector<16x1xf32>
    %37 = arith.addf %35, %36 : vector<16x1xf32>
    %38 = math.rsqrt %37 : vector<16x1xf32>
    %39 = vector.broadcast %38 : vector<16x1xf32> to vector<16x32xf32>
    %40 = arith.mulf %30, %39 : vector<16x32xf32>
    %41 = vector.extract_strided_slice %0 {offsets = [1, 0], sizes = [1, 32], strides = [1, 1]} : vector<16x128xf32> to vector<1x32xf32>
    %42 = vector.broadcast %41 : vector<1x32xf32> to vector<16x32xf32>
    %43 = arith.mulf %40, %42 : vector<16x32xf32>
    %44 = vector.extract_strided_slice %0 {offsets = [2, 0], sizes = [1, 32], strides = [1, 1]} : vector<16x128xf32> to vector<1x32xf32>
    %45 = vector.broadcast %44 : vector<1x32xf32> to vector<16x32xf32>
    %46 = arith.addf %43, %45 : vector<16x32xf32>
    %47 = vector.extract_strided_slice %1 {offsets = [0, 0], sizes = [16, 32], strides = [1, 1]} : vector<16x128xf32> to vector<16x32xf32>
    %48 = vector.extract_strided_slice %1 {offsets = [0, 32], sizes = [16, 32], strides = [1, 1]} : vector<16x128xf32> to vector<16x32xf32>
    %49 = vector.extract_strided_slice %1 {offsets = [0, 64], sizes = [16, 16], strides = [1, 1]} : vector<16x128xf32> to vector<16x16xf32>
    %50 = arith.mulf %46, %48 : vector<16x32xf32>
    %51 = arith.addf %50, %47 : vector<16x32xf32>
    %cst_17 = arith.constant dense<0.000000e+00> : vector<16xf32>
    %52 = vector.multi_reduction <add>, %51, %cst_17 [1] : vector<16x32xf32> to vector<16xf32>
    %53 = vector.shape_cast %52 : vector<16xf32> to vector<16x1xf32>
    %cst_18 = arith.constant 3.200000e+01 : f32
    %54 = vector.broadcast %cst_18 : f32 to vector<16x1xf32>
    %55 = arith.divf %53, %54 : vector<16x1xf32>
    %56 = vector.broadcast %55 : vector<16x1xf32> to vector<16x32xf32>
    %57 = arith.subf %51, %56 : vector<16x32xf32>
    %58 = arith.mulf %57, %57 : vector<16x32xf32>
    %cst_19 = arith.constant dense<0.000000e+00> : vector<16xf32>
    %59 = vector.multi_reduction <add>, %58, %cst_19 [1] : vector<16x32xf32> to vector<16xf32>
    %60 = vector.shape_cast %59 : vector<16xf32> to vector<16x1xf32>
    %cst_20 = arith.constant 3.200000e+01 : f32
    %61 = vector.broadcast %cst_20 : f32 to vector<16x1xf32>
    %62 = arith.divf %60, %61 : vector<16x1xf32>
    %cst_21 = arith.constant 9.99999974E-6 : f32
    %63 = vector.broadcast %cst_21 : f32 to vector<16x1xf32>
    %64 = arith.addf %62, %63 : vector<16x1xf32>
    %65 = math.rsqrt %64 : vector<16x1xf32>
    %66 = vector.broadcast %65 : vector<16x1xf32> to vector<16x32xf32>
    %67 = arith.mulf %57, %66 : vector<16x32xf32>
    %68 = vector.extract_strided_slice %0 {offsets = [3, 0], sizes = [1, 32], strides = [1, 1]} : vector<16x128xf32> to vector<1x32xf32>
    %69 = vector.broadcast %68 : vector<1x32xf32> to vector<16x32xf32>
    %70 = arith.mulf %67, %69 : vector<16x32xf32>
    %71 = vector.extract_strided_slice %0 {offsets = [4, 0], sizes = [1, 32], strides = [1, 1]} : vector<16x128xf32> to vector<1x32xf32>
    %72 = vector.broadcast %71 : vector<1x32xf32> to vector<16x32xf32>
    %73 = arith.addf %70, %72 : vector<16x32xf32>
    %74 = arith.truncf %73 : vector<16x32xf32> to vector<16x32xbf16>
    %c0_22 = arith.constant 0 : index
    %c0_23 = arith.constant 0 : index
    %75 = vector.load %arg4[%c0_22, %c0_23] : memref<288x128xbf16, #tpu.memory_space<vmem>>, vector<32x64xbf16>
    %cst_24 = arith.constant dense<0.000000e+00> : vector<16x64xf32>
    %76 = tpu.matmul %74, %75, %cst_24 {dimension_numbers = #tpu.dot_dimension_numbers<[1], [0], [0], [1], [0, 0, 1, 1], [], []>} : vector<16x32xbf16>, vector<32x64xbf16>, vector<16x64xf32> -> vector<16x64xf32>
    %c32 = arith.constant 32 : index
    %c0_25 = arith.constant 0 : index
    %77 = vector.load %arg4[%c32, %c0_25] : memref<288x128xbf16, #tpu.memory_space<vmem>>, vector<32x128xbf16>
    %cst_26 = arith.constant dense<0.000000e+00> : vector<16x128xf32>
    %78 = tpu.matmul %74, %77, %cst_26 {dimension_numbers = #tpu.dot_dimension_numbers<[1], [0], [0], [1], [0, 0, 1, 1], [], []>} : vector<16x32xbf16>, vector<32x128xbf16>, vector<16x128xf32> -> vector<16x128xf32>
    %cst_27 = arith.constant 0.000000e+00 : f32
    %79 = vector.broadcast %cst_27 : f32 to vector<16x32xf32>
    %80 = vector.extract_strided_slice %76 {offsets = [0, 0], sizes = [16, 8], strides = [1, 1]} : vector<16x64xf32> to vector<16x8xf32>
    %81 = vector.extract_strided_slice %76 {offsets = [0, 32], sizes = [16, 8], strides = [1, 1]} : vector<16x64xf32> to vector<16x8xf32>
    %cst_28 = arith.constant dense<0.000000e+00> : vector<16x16xf32>
    %82 = tpu.matmul %80, %81, %cst_28 {dimension_numbers = #tpu.dot_dimension_numbers<[1], [1], [0], [0], [0, 0, 1, 0], [], []>} : vector<16x8xf32>, vector<16x8xf32>, vector<16x16xf32> -> vector<16x16xf32>
    %cst_29 = arith.constant 0.353553385 : f32
    %83 = vector.broadcast %cst_29 : f32 to vector<16x16xf32>
    %84 = arith.mulf %82, %83 : vector<16x16xf32>
    %85 = arith.addf %84, %49 : vector<16x16xf32>
    %cst_30 = arith.constant dense<0xFF800000> : vector<16xf32>
    %86 = vector.multi_reduction <maximumf>, %85, %cst_30 [1] : vector<16x16xf32> to vector<16xf32>
    %87 = vector.shape_cast %86 : vector<16xf32> to vector<16x1xf32>
    %88 = vector.broadcast %87 : vector<16x1xf32> to vector<16x16xf32>
    %89 = arith.subf %85, %88 : vector<16x16xf32>
    %90 = math.exp %89 : vector<16x16xf32>
    %cst_31 = arith.constant dense<0.000000e+00> : vector<16xf32>
    %91 = vector.multi_reduction <add>, %90, %cst_31 [1] : vector<16x16xf32> to vector<16xf32>
    %92 = vector.shape_cast %91 : vector<16xf32> to vector<16x1xf32>
    %93 = tpu.reciprocal %92 {approx = true} : vector<16x1xf32> -> vector<16x1xf32>
    %94 = vector.broadcast %93 : vector<16x1xf32> to vector<16x16xf32>
    %95 = arith.mulf %90, %94 : vector<16x16xf32>
    %96 = vector.extract_strided_slice %78 {offsets = [0, 0], sizes = [16, 32], strides = [1, 1]} : vector<16x128xf32> to vector<16x32xf32>
    %cst_32 = arith.constant dense<0.000000e+00> : vector<16x32xf32>
    %97 = tpu.matmul %95, %96, %cst_32 {dimension_numbers = #tpu.dot_dimension_numbers<[1], [0], [0], [1], [0, 0, 1, 1], [], []>} : vector<16x16xf32>, vector<16x32xf32>, vector<16x32xf32> -> vector<16x32xf32>
    %98 = arith.addf %79, %97 : vector<16x32xf32>
    %99 = vector.extract_strided_slice %76 {offsets = [0, 8], sizes = [16, 8], strides = [1, 1]} : vector<16x64xf32> to vector<16x8xf32>
    %100 = vector.extract_strided_slice %76 {offsets = [0, 40], sizes = [16, 8], strides = [1, 1]} : vector<16x64xf32> to vector<16x8xf32>
    %cst_33 = arith.constant dense<0.000000e+00> : vector<16x16xf32>
    %101 = tpu.matmul %99, %100, %cst_33 {dimension_numbers = #tpu.dot_dimension_numbers<[1], [1], [0], [0], [0, 0, 1, 0], [], []>} : vector<16x8xf32>, vector<16x8xf32>, vector<16x16xf32> -> vector<16x16xf32>
    %cst_34 = arith.constant 0.353553385 : f32
    %102 = vector.broadcast %cst_34 : f32 to vector<16x16xf32>
    %103 = arith.mulf %101, %102 : vector<16x16xf32>
    %104 = arith.addf %103, %49 : vector<16x16xf32>
    %cst_35 = arith.constant dense<0xFF800000> : vector<16xf32>
    %105 = vector.multi_reduction <maximumf>, %104, %cst_35 [1] : vector<16x16xf32> to vector<16xf32>
    %106 = vector.shape_cast %105 : vector<16xf32> to vector<16x1xf32>
    %107 = vector.broadcast %106 : vector<16x1xf32> to vector<16x16xf32>
    %108 = arith.subf %104, %107 : vector<16x16xf32>
    %109 = math.exp %108 : vector<16x16xf32>
    %cst_36 = arith.constant dense<0.000000e+00> : vector<16xf32>
    %110 = vector.multi_reduction <add>, %109, %cst_36 [1] : vector<16x16xf32> to vector<16xf32>
    %111 = vector.shape_cast %110 : vector<16xf32> to vector<16x1xf32>
    %112 = tpu.reciprocal %111 {approx = true} : vector<16x1xf32> -> vector<16x1xf32>
    %113 = vector.broadcast %112 : vector<16x1xf32> to vector<16x16xf32>
    %114 = arith.mulf %109, %113 : vector<16x16xf32>
    %115 = vector.extract_strided_slice %78 {offsets = [0, 32], sizes = [16, 32], strides = [1, 1]} : vector<16x128xf32> to vector<16x32xf32>
    %cst_37 = arith.constant dense<0.000000e+00> : vector<16x32xf32>
    %116 = tpu.matmul %114, %115, %cst_37 {dimension_numbers = #tpu.dot_dimension_numbers<[1], [0], [0], [1], [0, 0, 1, 1], [], []>} : vector<16x16xf32>, vector<16x32xf32>, vector<16x32xf32> -> vector<16x32xf32>
    %117 = arith.addf %98, %116 : vector<16x32xf32>
    %118 = vector.extract_strided_slice %76 {offsets = [0, 16], sizes = [16, 8], strides = [1, 1]} : vector<16x64xf32> to vector<16x8xf32>
    %119 = vector.extract_strided_slice %76 {offsets = [0, 48], sizes = [16, 8], strides = [1, 1]} : vector<16x64xf32> to vector<16x8xf32>
    %cst_38 = arith.constant dense<0.000000e+00> : vector<16x16xf32>
    %120 = tpu.matmul %118, %119, %cst_38 {dimension_numbers = #tpu.dot_dimension_numbers<[1], [1], [0], [0], [0, 0, 1, 0], [], []>} : vector<16x8xf32>, vector<16x8xf32>, vector<16x16xf32> -> vector<16x16xf32>
    %cst_39 = arith.constant 0.353553385 : f32
    %121 = vector.broadcast %cst_39 : f32 to vector<16x16xf32>
    %122 = arith.mulf %120, %121 : vector<16x16xf32>
    %123 = arith.addf %122, %49 : vector<16x16xf32>
    %cst_40 = arith.constant dense<0xFF800000> : vector<16xf32>
    %124 = vector.multi_reduction <maximumf>, %123, %cst_40 [1] : vector<16x16xf32> to vector<16xf32>
    %125 = vector.shape_cast %124 : vector<16xf32> to vector<16x1xf32>
    %126 = vector.broadcast %125 : vector<16x1xf32> to vector<16x16xf32>
    %127 = arith.subf %123, %126 : vector<16x16xf32>
    %128 = math.exp %127 : vector<16x16xf32>
    %cst_41 = arith.constant dense<0.000000e+00> : vector<16xf32>
    %129 = vector.multi_reduction <add>, %128, %cst_41 [1] : vector<16x16xf32> to vector<16xf32>
    %130 = vector.shape_cast %129 : vector<16xf32> to vector<16x1xf32>
    %131 = tpu.reciprocal %130 {approx = true} : vector<16x1xf32> -> vector<16x1xf32>
    %132 = vector.broadcast %131 : vector<16x1xf32> to vector<16x16xf32>
    %133 = arith.mulf %128, %132 : vector<16x16xf32>
    %134 = vector.extract_strided_slice %78 {offsets = [0, 64], sizes = [16, 32], strides = [1, 1]} : vector<16x128xf32> to vector<16x32xf32>
    %cst_42 = arith.constant dense<0.000000e+00> : vector<16x32xf32>
    %135 = tpu.matmul %133, %134, %cst_42 {dimension_numbers = #tpu.dot_dimension_numbers<[1], [0], [0], [1], [0, 0, 1, 1], [], []>} : vector<16x16xf32>, vector<16x32xf32>, vector<16x32xf32> -> vector<16x32xf32>
    %136 = arith.addf %117, %135 : vector<16x32xf32>
    %137 = vector.extract_strided_slice %76 {offsets = [0, 24], sizes = [16, 8], strides = [1, 1]} : vector<16x64xf32> to vector<16x8xf32>
    %138 = vector.extract_strided_slice %76 {offsets = [0, 56], sizes = [16, 8], strides = [1, 1]} : vector<16x64xf32> to vector<16x8xf32>
    %cst_43 = arith.constant dense<0.000000e+00> : vector<16x16xf32>
    %139 = tpu.matmul %137, %138, %cst_43 {dimension_numbers = #tpu.dot_dimension_numbers<[1], [1], [0], [0], [0, 0, 1, 0], [], []>} : vector<16x8xf32>, vector<16x8xf32>, vector<16x16xf32> -> vector<16x16xf32>
    %cst_44 = arith.constant 0.353553385 : f32
    %140 = vector.broadcast %cst_44 : f32 to vector<16x16xf32>
    %141 = arith.mulf %139, %140 : vector<16x16xf32>
    %142 = arith.addf %141, %49 : vector<16x16xf32>
    %cst_45 = arith.constant dense<0xFF800000> : vector<16xf32>
    %143 = vector.multi_reduction <maximumf>, %142, %cst_45 [1] : vector<16x16xf32> to vector<16xf32>
    %144 = vector.shape_cast %143 : vector<16xf32> to vector<16x1xf32>
    %145 = vector.broadcast %144 : vector<16x1xf32> to vector<16x16xf32>
    %146 = arith.subf %142, %145 : vector<16x16xf32>
    %147 = math.exp %146 : vector<16x16xf32>
    %cst_46 = arith.constant dense<0.000000e+00> : vector<16xf32>
    %148 = vector.multi_reduction <add>, %147, %cst_46 [1] : vector<16x16xf32> to vector<16xf32>
    %149 = vector.shape_cast %148 : vector<16xf32> to vector<16x1xf32>
    %150 = tpu.reciprocal %149 {approx = true} : vector<16x1xf32> -> vector<16x1xf32>
    %151 = vector.broadcast %150 : vector<16x1xf32> to vector<16x16xf32>
    %152 = arith.mulf %147, %151 : vector<16x16xf32>
    %153 = vector.extract_strided_slice %78 {offsets = [0, 96], sizes = [16, 32], strides = [1, 1]} : vector<16x128xf32> to vector<16x32xf32>
    %cst_47 = arith.constant dense<0.000000e+00> : vector<16x32xf32>
    %154 = tpu.matmul %152, %153, %cst_47 {dimension_numbers = #tpu.dot_dimension_numbers<[1], [0], [0], [1], [0, 0, 1, 1], [], []>} : vector<16x16xf32>, vector<16x32xf32>, vector<16x32xf32> -> vector<16x32xf32>
    %155 = arith.addf %136, %154 : vector<16x32xf32>
    %156 = arith.addf %51, %155 : vector<16x32xf32>
    %157 = vector.extract_strided_slice %0 {offsets = [5, 0], sizes = [1, 32], strides = [1, 1]} : vector<16x128xf32> to vector<1x32xf32>
    %158 = vector.broadcast %157 : vector<1x32xf32> to vector<16x32xf32>
    %159 = arith.addf %156, %158 : vector<16x32xf32>
    %cst_48 = arith.constant dense<0.000000e+00> : vector<16xf32>
    %160 = vector.multi_reduction <add>, %159, %cst_48 [1] : vector<16x32xf32> to vector<16xf32>
    %161 = vector.shape_cast %160 : vector<16xf32> to vector<16x1xf32>
    %cst_49 = arith.constant 3.200000e+01 : f32
    %162 = vector.broadcast %cst_49 : f32 to vector<16x1xf32>
    %163 = arith.divf %161, %162 : vector<16x1xf32>
    %164 = vector.broadcast %163 : vector<16x1xf32> to vector<16x32xf32>
    %165 = arith.subf %159, %164 : vector<16x32xf32>
    %166 = arith.mulf %165, %165 : vector<16x32xf32>
    %cst_50 = arith.constant dense<0.000000e+00> : vector<16xf32>
    %167 = vector.multi_reduction <add>, %166, %cst_50 [1] : vector<16x32xf32> to vector<16xf32>
    %168 = vector.shape_cast %167 : vector<16xf32> to vector<16x1xf32>
    %cst_51 = arith.constant 3.200000e+01 : f32
    %169 = vector.broadcast %cst_51 : f32 to vector<16x1xf32>
    %170 = arith.divf %168, %169 : vector<16x1xf32>
    %cst_52 = arith.constant 9.99999974E-6 : f32
    %171 = vector.broadcast %cst_52 : f32 to vector<16x1xf32>
    %172 = arith.addf %170, %171 : vector<16x1xf32>
    %173 = math.rsqrt %172 : vector<16x1xf32>
    %174 = vector.broadcast %173 : vector<16x1xf32> to vector<16x32xf32>
    %175 = arith.mulf %165, %174 : vector<16x32xf32>
    %176 = arith.truncf %175 : vector<16x32xf32> to vector<16x32xbf16>
    %c64 = arith.constant 64 : index
    %c0_53 = arith.constant 0 : index
    %177 = vector.load %arg4[%c64, %c0_53] : memref<288x128xbf16, #tpu.memory_space<vmem>>, vector<32x64xbf16>
    %cst_54 = arith.constant dense<0.000000e+00> : vector<16x64xf32>
    %178 = tpu.matmul %176, %177, %cst_54 {dimension_numbers = #tpu.dot_dimension_numbers<[1], [0], [0], [1], [0, 0, 1, 1], [], []>} : vector<16x32xbf16>, vector<32x64xbf16>, vector<16x64xf32> -> vector<16x64xf32>
    %179 = vector.extract_strided_slice %0 {offsets = [6, 0], sizes = [1, 64], strides = [1, 1]} : vector<16x128xf32> to vector<1x64xf32>
    %180 = vector.broadcast %179 : vector<1x64xf32> to vector<16x64xf32>
    %181 = arith.addf %178, %180 : vector<16x64xf32>
    %cst_55 = arith.constant 5.000000e-01 : f32
    %182 = vector.broadcast %cst_55 : f32 to vector<16x64xf32>
    %183 = arith.mulf %182, %181 : vector<16x64xf32>
    %cst_56 = arith.constant 4.471500e-02 : f32
    %184 = vector.broadcast %cst_56 : f32 to vector<16x64xf32>
    %185 = arith.mulf %184, %181 : vector<16x64xf32>
    %186 = arith.mulf %185, %181 : vector<16x64xf32>
    %187 = arith.mulf %186, %181 : vector<16x64xf32>
    %188 = arith.addf %181, %187 : vector<16x64xf32>
    %cst_57 = arith.constant 0.797884583 : f32
    %189 = vector.broadcast %cst_57 : f32 to vector<16x64xf32>
    %190 = arith.mulf %189, %188 : vector<16x64xf32>
    %191 = math.tanh %190 : vector<16x64xf32>
    %cst_58 = arith.constant 1.000000e+00 : f32
    %192 = vector.broadcast %cst_58 : f32 to vector<16x64xf32>
    %193 = arith.addf %192, %191 : vector<16x64xf32>
    %194 = arith.mulf %183, %193 : vector<16x64xf32>
    %195 = arith.truncf %194 : vector<16x64xf32> to vector<16x64xbf16>
    %c0_59 = arith.constant 0 : index
    %c0_60 = arith.constant 0 : index
    %196 = vector.load %arg5[%c0_59, %c0_60] : memref<192x128xbf16, #tpu.memory_space<vmem>>, vector<64x32xbf16>
    %cst_61 = arith.constant dense<0.000000e+00> : vector<16x32xf32>
    %197 = tpu.matmul %195, %196, %cst_61 {dimension_numbers = #tpu.dot_dimension_numbers<[1], [0], [0], [1], [0, 0, 1, 1], [], []>} : vector<16x64xbf16>, vector<64x32xbf16>, vector<16x32xf32> -> vector<16x32xf32>
    %198 = vector.extract_strided_slice %0 {offsets = [7, 0], sizes = [1, 32], strides = [1, 1]} : vector<16x128xf32> to vector<1x32xf32>
    %199 = vector.broadcast %198 : vector<1x32xf32> to vector<16x32xf32>
    %200 = arith.addf %197, %199 : vector<16x32xf32>
    %201 = arith.addf %159, %200 : vector<16x32xf32>
    %cst_62 = arith.constant dense<0.000000e+00> : vector<16xf32>
    %202 = vector.multi_reduction <add>, %201, %cst_62 [1] : vector<16x32xf32> to vector<16xf32>
    %203 = vector.shape_cast %202 : vector<16xf32> to vector<16x1xf32>
    %cst_63 = arith.constant 3.200000e+01 : f32
    %204 = vector.broadcast %cst_63 : f32 to vector<16x1xf32>
    %205 = arith.divf %203, %204 : vector<16x1xf32>
    %206 = vector.broadcast %205 : vector<16x1xf32> to vector<16x32xf32>
    %207 = arith.subf %201, %206 : vector<16x32xf32>
    %208 = arith.mulf %207, %207 : vector<16x32xf32>
    %cst_64 = arith.constant dense<0.000000e+00> : vector<16xf32>
    %209 = vector.multi_reduction <add>, %208, %cst_64 [1] : vector<16x32xf32> to vector<16xf32>
    %210 = vector.shape_cast %209 : vector<16xf32> to vector<16x1xf32>
    %cst_65 = arith.constant 3.200000e+01 : f32
    %211 = vector.broadcast %cst_65 : f32 to vector<16x1xf32>
    %212 = arith.divf %210, %211 : vector<16x1xf32>
    %cst_66 = arith.constant 9.99999974E-6 : f32
    %213 = vector.broadcast %cst_66 : f32 to vector<16x1xf32>
    %214 = arith.addf %212, %213 : vector<16x1xf32>
    %215 = math.rsqrt %214 : vector<16x1xf32>
    %216 = vector.broadcast %215 : vector<16x1xf32> to vector<16x32xf32>
    %217 = arith.mulf %207, %216 : vector<16x32xf32>
    %218 = vector.extract_strided_slice %0 {offsets = [8, 0], sizes = [1, 32], strides = [1, 1]} : vector<16x128xf32> to vector<1x32xf32>
    %219 = vector.broadcast %218 : vector<1x32xf32> to vector<16x32xf32>
    %220 = arith.mulf %217, %219 : vector<16x32xf32>
    %221 = vector.extract_strided_slice %0 {offsets = [9, 0], sizes = [1, 32], strides = [1, 1]} : vector<16x128xf32> to vector<1x32xf32>
    %222 = vector.broadcast %221 : vector<1x32xf32> to vector<16x32xf32>
    %223 = arith.addf %220, %222 : vector<16x32xf32>
    %224 = arith.truncf %223 : vector<16x32xf32> to vector<16x32xbf16>
    %c96 = arith.constant 96 : index
    %c0_67 = arith.constant 0 : index
    %225 = vector.load %arg4[%c96, %c0_67] : memref<288x128xbf16, #tpu.memory_space<vmem>>, vector<32x64xbf16>
    %cst_68 = arith.constant dense<0.000000e+00> : vector<16x64xf32>
    %226 = tpu.matmul %224, %225, %cst_68 {dimension_numbers = #tpu.dot_dimension_numbers<[1], [0], [0], [1], [0, 0, 1, 1], [], []>} : vector<16x32xbf16>, vector<32x64xbf16>, vector<16x64xf32> -> vector<16x64xf32>
    %c128 = arith.constant 128 : index
    %c0_69 = arith.constant 0 : index
    %227 = vector.load %arg4[%c128, %c0_69] : memref<288x128xbf16, #tpu.memory_space<vmem>>, vector<32x128xbf16>
    %cst_70 = arith.constant dense<0.000000e+00> : vector<16x128xf32>
    %228 = tpu.matmul %224, %227, %cst_70 {dimension_numbers = #tpu.dot_dimension_numbers<[1], [0], [0], [1], [0, 0, 1, 1], [], []>} : vector<16x32xbf16>, vector<32x128xbf16>, vector<16x128xf32> -> vector<16x128xf32>
    %cst_71 = arith.constant 0.000000e+00 : f32
    %229 = vector.broadcast %cst_71 : f32 to vector<16x32xf32>
    %230 = vector.extract_strided_slice %226 {offsets = [0, 0], sizes = [16, 8], strides = [1, 1]} : vector<16x64xf32> to vector<16x8xf32>
    %231 = vector.extract_strided_slice %226 {offsets = [0, 32], sizes = [16, 8], strides = [1, 1]} : vector<16x64xf32> to vector<16x8xf32>
    %cst_72 = arith.constant dense<0.000000e+00> : vector<16x16xf32>
    %232 = tpu.matmul %230, %231, %cst_72 {dimension_numbers = #tpu.dot_dimension_numbers<[1], [1], [0], [0], [0, 0, 1, 0], [], []>} : vector<16x8xf32>, vector<16x8xf32>, vector<16x16xf32> -> vector<16x16xf32>
    %cst_73 = arith.constant 0.353553385 : f32
    %233 = vector.broadcast %cst_73 : f32 to vector<16x16xf32>
    %234 = arith.mulf %232, %233 : vector<16x16xf32>
    %235 = arith.addf %234, %49 : vector<16x16xf32>
    %cst_74 = arith.constant dense<0xFF800000> : vector<16xf32>
    %236 = vector.multi_reduction <maximumf>, %235, %cst_74 [1] : vector<16x16xf32> to vector<16xf32>
    %237 = vector.shape_cast %236 : vector<16xf32> to vector<16x1xf32>
    %238 = vector.broadcast %237 : vector<16x1xf32> to vector<16x16xf32>
    %239 = arith.subf %235, %238 : vector<16x16xf32>
    %240 = math.exp %239 : vector<16x16xf32>
    %cst_75 = arith.constant dense<0.000000e+00> : vector<16xf32>
    %241 = vector.multi_reduction <add>, %240, %cst_75 [1] : vector<16x16xf32> to vector<16xf32>
    %242 = vector.shape_cast %241 : vector<16xf32> to vector<16x1xf32>
    %243 = tpu.reciprocal %242 {approx = true} : vector<16x1xf32> -> vector<16x1xf32>
    %244 = vector.broadcast %243 : vector<16x1xf32> to vector<16x16xf32>
    %245 = arith.mulf %240, %244 : vector<16x16xf32>
    %246 = vector.extract_strided_slice %228 {offsets = [0, 0], sizes = [16, 32], strides = [1, 1]} : vector<16x128xf32> to vector<16x32xf32>
    %cst_76 = arith.constant dense<0.000000e+00> : vector<16x32xf32>
    %247 = tpu.matmul %245, %246, %cst_76 {dimension_numbers = #tpu.dot_dimension_numbers<[1], [0], [0], [1], [0, 0, 1, 1], [], []>} : vector<16x16xf32>, vector<16x32xf32>, vector<16x32xf32> -> vector<16x32xf32>
    %248 = arith.addf %229, %247 : vector<16x32xf32>
    %249 = vector.extract_strided_slice %226 {offsets = [0, 8], sizes = [16, 8], strides = [1, 1]} : vector<16x64xf32> to vector<16x8xf32>
    %250 = vector.extract_strided_slice %226 {offsets = [0, 40], sizes = [16, 8], strides = [1, 1]} : vector<16x64xf32> to vector<16x8xf32>
    %cst_77 = arith.constant dense<0.000000e+00> : vector<16x16xf32>
    %251 = tpu.matmul %249, %250, %cst_77 {dimension_numbers = #tpu.dot_dimension_numbers<[1], [1], [0], [0], [0, 0, 1, 0], [], []>} : vector<16x8xf32>, vector<16x8xf32>, vector<16x16xf32> -> vector<16x16xf32>
    %cst_78 = arith.constant 0.353553385 : f32
    %252 = vector.broadcast %cst_78 : f32 to vector<16x16xf32>
    %253 = arith.mulf %251, %252 : vector<16x16xf32>
    %254 = arith.addf %253, %49 : vector<16x16xf32>
    %cst_79 = arith.constant dense<0xFF800000> : vector<16xf32>
    %255 = vector.multi_reduction <maximumf>, %254, %cst_79 [1] : vector<16x16xf32> to vector<16xf32>
    %256 = vector.shape_cast %255 : vector<16xf32> to vector<16x1xf32>
    %257 = vector.broadcast %256 : vector<16x1xf32> to vector<16x16xf32>
    %258 = arith.subf %254, %257 : vector<16x16xf32>
    %259 = math.exp %258 : vector<16x16xf32>
    %cst_80 = arith.constant dense<0.000000e+00> : vector<16xf32>
    %260 = vector.multi_reduction <add>, %259, %cst_80 [1] : vector<16x16xf32> to vector<16xf32>
    %261 = vector.shape_cast %260 : vector<16xf32> to vector<16x1xf32>
    %262 = tpu.reciprocal %261 {approx = true} : vector<16x1xf32> -> vector<16x1xf32>
    %263 = vector.broadcast %262 : vector<16x1xf32> to vector<16x16xf32>
    %264 = arith.mulf %259, %263 : vector<16x16xf32>
    %265 = vector.extract_strided_slice %228 {offsets = [0, 32], sizes = [16, 32], strides = [1, 1]} : vector<16x128xf32> to vector<16x32xf32>
    %cst_81 = arith.constant dense<0.000000e+00> : vector<16x32xf32>
    %266 = tpu.matmul %264, %265, %cst_81 {dimension_numbers = #tpu.dot_dimension_numbers<[1], [0], [0], [1], [0, 0, 1, 1], [], []>} : vector<16x16xf32>, vector<16x32xf32>, vector<16x32xf32> -> vector<16x32xf32>
    %267 = arith.addf %248, %266 : vector<16x32xf32>
    %268 = vector.extract_strided_slice %226 {offsets = [0, 16], sizes = [16, 8], strides = [1, 1]} : vector<16x64xf32> to vector<16x8xf32>
    %269 = vector.extract_strided_slice %226 {offsets = [0, 48], sizes = [16, 8], strides = [1, 1]} : vector<16x64xf32> to vector<16x8xf32>
    %cst_82 = arith.constant dense<0.000000e+00> : vector<16x16xf32>
    %270 = tpu.matmul %268, %269, %cst_82 {dimension_numbers = #tpu.dot_dimension_numbers<[1], [1], [0], [0], [0, 0, 1, 0], [], []>} : vector<16x8xf32>, vector<16x8xf32>, vector<16x16xf32> -> vector<16x16xf32>
    %cst_83 = arith.constant 0.353553385 : f32
    %271 = vector.broadcast %cst_83 : f32 to vector<16x16xf32>
    %272 = arith.mulf %270, %271 : vector<16x16xf32>
    %273 = arith.addf %272, %49 : vector<16x16xf32>
    %cst_84 = arith.constant dense<0xFF800000> : vector<16xf32>
    %274 = vector.multi_reduction <maximumf>, %273, %cst_84 [1] : vector<16x16xf32> to vector<16xf32>
    %275 = vector.shape_cast %274 : vector<16xf32> to vector<16x1xf32>
    %276 = vector.broadcast %275 : vector<16x1xf32> to vector<16x16xf32>
    %277 = arith.subf %273, %276 : vector<16x16xf32>
    %278 = math.exp %277 : vector<16x16xf32>
    %cst_85 = arith.constant dense<0.000000e+00> : vector<16xf32>
    %279 = vector.multi_reduction <add>, %278, %cst_85 [1] : vector<16x16xf32> to vector<16xf32>
    %280 = vector.shape_cast %279 : vector<16xf32> to vector<16x1xf32>
    %281 = tpu.reciprocal %280 {approx = true} : vector<16x1xf32> -> vector<16x1xf32>
    %282 = vector.broadcast %281 : vector<16x1xf32> to vector<16x16xf32>
    %283 = arith.mulf %278, %282 : vector<16x16xf32>
    %284 = vector.extract_strided_slice %228 {offsets = [0, 64], sizes = [16, 32], strides = [1, 1]} : vector<16x128xf32> to vector<16x32xf32>
    %cst_86 = arith.constant dense<0.000000e+00> : vector<16x32xf32>
    %285 = tpu.matmul %283, %284, %cst_86 {dimension_numbers = #tpu.dot_dimension_numbers<[1], [0], [0], [1], [0, 0, 1, 1], [], []>} : vector<16x16xf32>, vector<16x32xf32>, vector<16x32xf32> -> vector<16x32xf32>
    %286 = arith.addf %267, %285 : vector<16x32xf32>
    %287 = vector.extract_strided_slice %226 {offsets = [0, 24], sizes = [16, 8], strides = [1, 1]} : vector<16x64xf32> to vector<16x8xf32>
    %288 = vector.extract_strided_slice %226 {offsets = [0, 56], sizes = [16, 8], strides = [1, 1]} : vector<16x64xf32> to vector<16x8xf32>
    %cst_87 = arith.constant dense<0.000000e+00> : vector<16x16xf32>
    %289 = tpu.matmul %287, %288, %cst_87 {dimension_numbers = #tpu.dot_dimension_numbers<[1], [1], [0], [0], [0, 0, 1, 0], [], []>} : vector<16x8xf32>, vector<16x8xf32>, vector<16x16xf32> -> vector<16x16xf32>
    %cst_88 = arith.constant 0.353553385 : f32
    %290 = vector.broadcast %cst_88 : f32 to vector<16x16xf32>
    %291 = arith.mulf %289, %290 : vector<16x16xf32>
    %292 = arith.addf %291, %49 : vector<16x16xf32>
    %cst_89 = arith.constant dense<0xFF800000> : vector<16xf32>
    %293 = vector.multi_reduction <maximumf>, %292, %cst_89 [1] : vector<16x16xf32> to vector<16xf32>
    %294 = vector.shape_cast %293 : vector<16xf32> to vector<16x1xf32>
    %295 = vector.broadcast %294 : vector<16x1xf32> to vector<16x16xf32>
    %296 = arith.subf %292, %295 : vector<16x16xf32>
    %297 = math.exp %296 : vector<16x16xf32>
    %cst_90 = arith.constant dense<0.000000e+00> : vector<16xf32>
    %298 = vector.multi_reduction <add>, %297, %cst_90 [1] : vector<16x16xf32> to vector<16xf32>
    %299 = vector.shape_cast %298 : vector<16xf32> to vector<16x1xf32>
    %300 = tpu.reciprocal %299 {approx = true} : vector<16x1xf32> -> vector<16x1xf32>
    %301 = vector.broadcast %300 : vector<16x1xf32> to vector<16x16xf32>
    %302 = arith.mulf %297, %301 : vector<16x16xf32>
    %303 = vector.extract_strided_slice %228 {offsets = [0, 96], sizes = [16, 32], strides = [1, 1]} : vector<16x128xf32> to vector<16x32xf32>
    %cst_91 = arith.constant dense<0.000000e+00> : vector<16x32xf32>
    %304 = tpu.matmul %302, %303, %cst_91 {dimension_numbers = #tpu.dot_dimension_numbers<[1], [0], [0], [1], [0, 0, 1, 1], [], []>} : vector<16x16xf32>, vector<16x32xf32>, vector<16x32xf32> -> vector<16x32xf32>
    %305 = arith.addf %286, %304 : vector<16x32xf32>
    %306 = arith.addf %201, %305 : vector<16x32xf32>
    %307 = vector.extract_strided_slice %0 {offsets = [10, 0], sizes = [1, 32], strides = [1, 1]} : vector<16x128xf32> to vector<1x32xf32>
    %308 = vector.broadcast %307 : vector<1x32xf32> to vector<16x32xf32>
    %309 = arith.addf %306, %308 : vector<16x32xf32>
    %cst_92 = arith.constant dense<0.000000e+00> : vector<16xf32>
    %310 = vector.multi_reduction <add>, %309, %cst_92 [1] : vector<16x32xf32> to vector<16xf32>
    %311 = vector.shape_cast %310 : vector<16xf32> to vector<16x1xf32>
    %cst_93 = arith.constant 3.200000e+01 : f32
    %312 = vector.broadcast %cst_93 : f32 to vector<16x1xf32>
    %313 = arith.divf %311, %312 : vector<16x1xf32>
    %314 = vector.broadcast %313 : vector<16x1xf32> to vector<16x32xf32>
    %315 = arith.subf %309, %314 : vector<16x32xf32>
    %316 = arith.mulf %315, %315 : vector<16x32xf32>
    %cst_94 = arith.constant dense<0.000000e+00> : vector<16xf32>
    %317 = vector.multi_reduction <add>, %316, %cst_94 [1] : vector<16x32xf32> to vector<16xf32>
    %318 = vector.shape_cast %317 : vector<16xf32> to vector<16x1xf32>
    %cst_95 = arith.constant 3.200000e+01 : f32
    %319 = vector.broadcast %cst_95 : f32 to vector<16x1xf32>
    %320 = arith.divf %318, %319 : vector<16x1xf32>
    %cst_96 = arith.constant 9.99999974E-6 : f32
    %321 = vector.broadcast %cst_96 : f32 to vector<16x1xf32>
    %322 = arith.addf %320, %321 : vector<16x1xf32>
    %323 = math.rsqrt %322 : vector<16x1xf32>
    %324 = vector.broadcast %323 : vector<16x1xf32> to vector<16x32xf32>
    %325 = arith.mulf %315, %324 : vector<16x32xf32>
    %326 = arith.truncf %325 : vector<16x32xf32> to vector<16x32xbf16>
    %c160 = arith.constant 160 : index
    %c0_97 = arith.constant 0 : index
    %327 = vector.load %arg4[%c160, %c0_97] : memref<288x128xbf16, #tpu.memory_space<vmem>>, vector<32x64xbf16>
    %cst_98 = arith.constant dense<0.000000e+00> : vector<16x64xf32>
    %328 = tpu.matmul %326, %327, %cst_98 {dimension_numbers = #tpu.dot_dimension_numbers<[1], [0], [0], [1], [0, 0, 1, 1], [], []>} : vector<16x32xbf16>, vector<32x64xbf16>, vector<16x64xf32> -> vector<16x64xf32>
    %329 = vector.extract_strided_slice %0 {offsets = [11, 0], sizes = [1, 64], strides = [1, 1]} : vector<16x128xf32> to vector<1x64xf32>
    %330 = vector.broadcast %329 : vector<1x64xf32> to vector<16x64xf32>
    %331 = arith.addf %328, %330 : vector<16x64xf32>
    %cst_99 = arith.constant 5.000000e-01 : f32
    %332 = vector.broadcast %cst_99 : f32 to vector<16x64xf32>
    %333 = arith.mulf %332, %331 : vector<16x64xf32>
    %cst_100 = arith.constant 4.471500e-02 : f32
    %334 = vector.broadcast %cst_100 : f32 to vector<16x64xf32>
    %335 = arith.mulf %334, %331 : vector<16x64xf32>
    %336 = arith.mulf %335, %331 : vector<16x64xf32>
    %337 = arith.mulf %336, %331 : vector<16x64xf32>
    %338 = arith.addf %331, %337 : vector<16x64xf32>
    %cst_101 = arith.constant 0.797884583 : f32
    %339 = vector.broadcast %cst_101 : f32 to vector<16x64xf32>
    %340 = arith.mulf %339, %338 : vector<16x64xf32>
    %341 = math.tanh %340 : vector<16x64xf32>
    %cst_102 = arith.constant 1.000000e+00 : f32
    %342 = vector.broadcast %cst_102 : f32 to vector<16x64xf32>
    %343 = arith.addf %342, %341 : vector<16x64xf32>
    %344 = arith.mulf %333, %343 : vector<16x64xf32>
    %345 = arith.truncf %344 : vector<16x64xf32> to vector<16x64xbf16>
    %c64_103 = arith.constant 64 : index
    %c0_104 = arith.constant 0 : index
    %346 = vector.load %arg5[%c64_103, %c0_104] : memref<192x128xbf16, #tpu.memory_space<vmem>>, vector<64x32xbf16>
    %cst_105 = arith.constant dense<0.000000e+00> : vector<16x32xf32>
    %347 = tpu.matmul %345, %346, %cst_105 {dimension_numbers = #tpu.dot_dimension_numbers<[1], [0], [0], [1], [0, 0, 1, 1], [], []>} : vector<16x64xbf16>, vector<64x32xbf16>, vector<16x32xf32> -> vector<16x32xf32>
    %348 = vector.extract_strided_slice %0 {offsets = [12, 0], sizes = [1, 32], strides = [1, 1]} : vector<16x128xf32> to vector<1x32xf32>
    %349 = vector.broadcast %348 : vector<1x32xf32> to vector<16x32xf32>
    %350 = arith.addf %347, %349 : vector<16x32xf32>
    %351 = arith.addf %309, %350 : vector<16x32xf32>
    %cst_106 = arith.constant dense<0.000000e+00> : vector<16xf32>
    %352 = vector.multi_reduction <add>, %351, %cst_106 [1] : vector<16x32xf32> to vector<16xf32>
    %353 = vector.shape_cast %352 : vector<16xf32> to vector<16x1xf32>
    %cst_107 = arith.constant 3.200000e+01 : f32
    %354 = vector.broadcast %cst_107 : f32 to vector<16x1xf32>
    %355 = arith.divf %353, %354 : vector<16x1xf32>
    %356 = vector.broadcast %355 : vector<16x1xf32> to vector<16x32xf32>
    %357 = arith.subf %351, %356 : vector<16x32xf32>
    %358 = arith.mulf %357, %357 : vector<16x32xf32>
    %cst_108 = arith.constant dense<0.000000e+00> : vector<16xf32>
    %359 = vector.multi_reduction <add>, %358, %cst_108 [1] : vector<16x32xf32> to vector<16xf32>
    %360 = vector.shape_cast %359 : vector<16xf32> to vector<16x1xf32>
    %cst_109 = arith.constant 3.200000e+01 : f32
    %361 = vector.broadcast %cst_109 : f32 to vector<16x1xf32>
    %362 = arith.divf %360, %361 : vector<16x1xf32>
    %cst_110 = arith.constant 9.99999974E-6 : f32
    %363 = vector.broadcast %cst_110 : f32 to vector<16x1xf32>
    %364 = arith.addf %362, %363 : vector<16x1xf32>
    %365 = math.rsqrt %364 : vector<16x1xf32>
    %366 = vector.broadcast %365 : vector<16x1xf32> to vector<16x32xf32>
    %367 = arith.mulf %357, %366 : vector<16x32xf32>
    %368 = arith.truncf %367 : vector<16x32xf32> to vector<16x32xbf16>
    %c192 = arith.constant 192 : index
    %c0_111 = arith.constant 0 : index
    %369 = vector.load %arg4[%c192, %c0_111] : memref<288x128xbf16, #tpu.memory_space<vmem>>, vector<32x32xbf16>
    %cst_112 = arith.constant dense<0.000000e+00> : vector<16x32xf32>
    %370 = tpu.matmul %368, %369, %cst_112 {dimension_numbers = #tpu.dot_dimension_numbers<[1], [0], [0], [1], [0, 0, 1, 1], [], []>} : vector<16x32xbf16>, vector<32x32xbf16>, vector<16x32xf32> -> vector<16x32xf32>
    %371 = vector.extract_strided_slice %0 {offsets = [13, 0], sizes = [1, 32], strides = [1, 1]} : vector<16x128xf32> to vector<1x32xf32>
    %372 = vector.broadcast %371 : vector<1x32xf32> to vector<16x32xf32>
    %373 = arith.addf %370, %372 : vector<16x32xf32>
    %374 = arith.truncf %373 : vector<16x32xf32> to vector<16x32xbf16>
    %c224 = arith.constant 224 : index
    %c0_113 = arith.constant 0 : index
    %375 = vector.load %arg4[%c224, %c0_113] : memref<288x128xbf16, #tpu.memory_space<vmem>>, vector<32x64xbf16>
    %cst_114 = arith.constant dense<0.000000e+00> : vector<16x64xf32>
    %376 = tpu.matmul %374, %375, %cst_114 {dimension_numbers = #tpu.dot_dimension_numbers<[1], [0], [0], [1], [0, 0, 1, 1], [], []>} : vector<16x32xbf16>, vector<32x64xbf16>, vector<16x64xf32> -> vector<16x64xf32>
    %377 = vector.extract_strided_slice %0 {offsets = [14, 0], sizes = [1, 64], strides = [1, 1]} : vector<16x128xf32> to vector<1x64xf32>
    %378 = vector.broadcast %377 : vector<1x64xf32> to vector<16x64xf32>
    %379 = arith.addf %376, %378 : vector<16x64xf32>
    %cst_115 = arith.constant 0.000000e+00 : f32
    %380 = vector.broadcast %cst_115 : f32 to vector<16x64xf32>
    %381 = arith.maximumf %379, %380 : vector<16x64xf32>
    %382 = arith.truncf %381 : vector<16x64xf32> to vector<16x64xbf16>
    %c128_116 = arith.constant 128 : index
    %c0_117 = arith.constant 0 : index
    %383 = vector.load %arg5[%c128_116, %c0_117] : memref<192x128xbf16, #tpu.memory_space<vmem>>, vector<64x128xbf16>
    %cst_118 = arith.constant dense<0.000000e+00> : vector<16x128xf32>
    %384 = tpu.matmul %382, %383, %cst_118 {dimension_numbers = #tpu.dot_dimension_numbers<[1], [0], [0], [1], [0, 0, 1, 1], [], []>} : vector<16x64xbf16>, vector<64x128xbf16>, vector<16x128xf32> -> vector<16x128xf32>
    %c256 = arith.constant 256 : index
    %c0_119 = arith.constant 0 : index
    %385 = vector.load %arg4[%c256, %c0_119] : memref<288x128xbf16, #tpu.memory_space<vmem>>, vector<32x128xbf16>
    %cst_120 = arith.constant dense<0.000000e+00> : vector<16x128xf32>
    %386 = tpu.matmul %374, %385, %cst_120 {dimension_numbers = #tpu.dot_dimension_numbers<[1], [0], [0], [1], [0, 0, 1, 1], [], []>} : vector<16x32xbf16>, vector<32x128xbf16>, vector<16x128xf32> -> vector<16x128xf32>
    %387 = arith.addf %384, %386 : vector<16x128xf32>
    %388 = vector.extract_strided_slice %0 {offsets = [15, 0], sizes = [1, 128], strides = [1, 1]} : vector<16x128xf32> to vector<1x128xf32>
    %389 = vector.broadcast %388 : vector<1x128xf32> to vector<16x128xf32>
    %390 = arith.addf %387, %389 : vector<16x128xf32>
    %c0_121 = arith.constant 0 : index
    %c0_122 = arith.constant 0 : index
    %391 = vector.load %arg7[%c0_121, %c0_122] : memref<16x128xf32, #tpu.memory_space<vmem>>, vector<16x128xf32>
    tpu.vector_store %arg7[%c0_121, %c0_122], %390 {strides = array<i32>} : memref<16x128xf32, #tpu.memory_space<vmem>>, vector<16x128xf32>,
    return
  }
  func.func @transform_0(%arg0: i32) -> (i32, i32) {
    %c0_i32 = arith.constant 0 : i32
    %c0_i32_0 = arith.constant 0 : i32
    return %arg0, %c0_i32 : i32, i32
  }
  func.func @transform_1(%arg0: i32) -> (i32, i32) {
    %c0_i32 = arith.constant 0 : i32
    %c0_i32_0 = arith.constant 0 : i32
    %c0_i32_1 = arith.constant 0 : i32
    return %c0_i32, %c0_i32_0 : i32, i32
  }
  func.func @transform_2(%arg0: i32) -> (i32, i32) {
    %c0_i32 = arith.constant 0 : i32
    %c0_i32_0 = arith.constant 0 : i32
    %c0_i32_1 = arith.constant 0 : i32
    return %c0_i32, %c0_i32_0 : i32, i32
  }
  func.func @transform_3(%arg0: i32) -> (i32, i32) {
    %c0_i32 = arith.constant 0 : i32
    %c0_i32_0 = arith.constant 0 : i32
    %c0_i32_1 = arith.constant 0 : i32
    return %c0_i32, %c0_i32_0 : i32, i32
  }
  func.func @transform_4(%arg0: i32) -> (i32, i32) {
    %c0_i32 = arith.constant 0 : i32
    %c0_i32_0 = arith.constant 0 : i32
    %c0_i32_1 = arith.constant 0 : i32
    return %c0_i32, %c0_i32_0 : i32, i32
  }
  func.func @transform_5(%arg0: i32) -> (i32, i32) {
    %c0_i32 = arith.constant 0 : i32
    %c0_i32_0 = arith.constant 0 : i32
    %c0_i32_1 = arith.constant 0 : i32
    return %c0_i32, %c0_i32_0 : i32, i32
  }
  func.func @transform_6(%arg0: i32) -> (i32, i32) {
    %c0_i32 = arith.constant 0 : i32
    %c0_i32_0 = arith.constant 0 : i32
    return %arg0, %c0_i32 : i32, i32
  }
}

</mosaic_0001>

<bundles_post_ra>
// kernel: cnn_actor_critic_forward.1
= control target key start
LH: loop header
LB: loop body
LE: loop exit
PB: predicated region body
PF: predicated region fallthrough
CT: control target
= control target key end

     0   :  { %v99_v50 = vlaneseq  ;;  %vm240_vm0 = vcmask 261120   ;;  %s3719_s16 = smov 96   ;;  %vm3721_vm1 = vmmov 0   ;;  %vm454_vm2 = vcmask 64512   ;;  %s3722_s24 = smov 112   ;;  %s4346_s0 = inlined_call_operand.vmem [shape: f32[16,256], index: 0, kind: input, shape index: {}]   ;;  %s4347_s2 = inlined_call_operand.vmem [shape: bf16[256,32], index: 2, kind: input, shape index: {}]   ;;  %s4348_s5 = inlined_call_operand.vmem [shape: f32[16,128], index: 5, kind: input, shape index: {}]   ;;  %s4349_s1 = inlined_call_operand.vmem [shape: f32[16,128], index: 1, kind: input, shape index: {}]   ;;  %s4350_s3 = inlined_call_operand.vmem [shape: bf16[288,128], index: 3, kind: input, shape index: {}]   ;;  %s4351_s4 = inlined_call_operand.vmem [shape: bf16[192,128], index: 4, kind: input, shape index: {}]   ;;  %s4352_s6 = inlined_call_operand.vmem [shape: f32[16,128], index: 6, kind: output, shape index: {}]  }
   0x1   :  { %v28_v0 = vld [vmem:[%s4346_s0] sm:$0xff]  ;;  %v29_v1 = vld [vmem:[%s4346_s0 + $0x8] sm:$0xff]  ;;  %v30_v2 = vld [vmem:[%s4346_s0 + $0x10] sm:$0xff]  ;;  %s3723_s25 = smov 80   ;;  %s3724_s26 = smov 64   ;;  %vm548_vm4 = vcmask 130048  }
   0x2   :  { %v32_v3 = vadd.f32 %v29_v1, %v28_v0  ;;  %v31_v4 = vld [vmem:[%s4346_s0 + $0x18] sm:$0xff]  ;;  %v3572_v6 = vld [vmem:[%s4347_s2 + $0x40] sm:$0xff]   ;;  %v3574_v8 = vld [vmem:[%s4347_s2 + $0x48] sm:$0xff]   ;;  %v3825_v51 = vshrl.u32 %v99_v50, 7  ;;  %v3720_v50 = vmov 0.0   ;;  %s3725_s27 = smov 88  }
   0x3   :  { %v35_v5 = vadd.f32 %v31_v4, %v30_v2  ;;  %v3573_v7 = vld [vmem:[%s4347_s2] sm:$0xff]   ;;  %3051 = vmatprep.subr.bf16.mxu0 %v3572_v6  ;;  %v3575_v9 = vld [vmem:[%s4347_s2 + $0x8] sm:$0xff]   ;;  %v3576_v24 = vld [vmem:[%s4347_s2 + $0x50] sm:$0xff]   ;;  %3179 = vmatprep.subr.bf16.mxu1 %v3720_v50  ;;  %s3726_s28 = smov 120   ;;  %s3727_s29 = smov 104   ;;  %vm1424_vm5 = vcmask 523264  }
   0x4   :  { %33 = vadd.xlane.f32.xlu0 %v32_v3  ;;  %3052 = vmatpush3.bf16.msra.mxu0 %v3573_v7  ;;  %v3577_v25 = vld [vmem:[%s4347_s2 + $0x10] sm:$0xff]   ;;  %v3578_v26 = vld [vmem:[%s4347_s2 + $0x58] sm:$0xff]   ;;  %v3580_v28 = vld [vmem:[%s4347_s2 + $0x60] sm:$0xff]   ;;  %v101_v52 = vsub.s32 0, %v3825_v51  ;;  %s3728_s30 = smov 72   ;;  %s3729_s7 = smov 32  }
   0x5   :  { %3053 = vmatprep.subr.bf16.mxu0 %v3574_v8  ;;  %v3579_v27 = vld [vmem:[%s4347_s2 + $0x18] sm:$0xff]   ;;  %v3581_v29 = vld [vmem:[%s4347_s2 + $0x20] sm:$0xff]   ;;  %v3582_v30 = vld [vmem:[%s4347_s2 + $0x68] sm:$0xff]   ;;  %3183 = vmatprep.mubr.msk.bf16.mxu1 %vm3721_vm1, %v3720_v50 }
   0x6   :  { %v3583_v31 = vld [vmem:[%s4347_s2 + $0x28] sm:$0xff]   ;;  %v3584_v32 = vld [vmem:[%s4347_s2 + $0x70] sm:$0xff]   ;;  %v3586_v34 = vld [vmem:[%s4347_s2 + $0x78] sm:$0xff]  }
   0x7   :  { %v3585_v33 = vld [vmem:[%s4347_s2 + $0x30] sm:$0xff]   ;;  %v3587_v35 = vld [vmem:[%s4347_s2 + $0x38] sm:$0xff]   ;;  %v3831_v53 = vld [vmem:[%s4348_s5] sm:$0xff] }
   0x8   :  { %36 = vadd.xlane.f32.xlu0 %v35_v5  ;;  %3054 = vmatpush3.bf16.msra.mxu0 %v3575_v9  ;;  %v102_v55 = vrot.slane %v3831_v53, %v101_v52  ;;  %vm3928_vm3 = vmpackc.low %vm454_vm2, %vm454_vm2 }
   0x9   :  { %3055 = vmatprep.subr.bf16.mxu0 %v3576_v24 }
   0xc   :  { %3056 = vmatpush3.bf16.msra.mxu0 %v3577_v25 }
   0xd   :  { %3057 = vmatprep.subr.bf16.mxu0 %v3578_v26 }
  0x10   :  { %3058 = vmatpush3.bf16.msra.mxu0 %v3579_v27 }
  0x11   :  { %3059 = vmatprep.subr.bf16.mxu0 %v3580_v28 }
  0x14   :  { %3060 = vmatpush3.bf16.msra.mxu0 %v3581_v29 }
  0x15   :  { %3061 = vmatprep.subr.bf16.mxu0 %v3582_v30 }
  0x18   :  { %3062 = vmatpush3.bf16.msra.mxu0 %v3583_v31 }
  0x19   :  { %3063 = vmatprep.subr.bf16.mxu0 %v3584_v32 }
  0x1c   :  { %3064 = vmatpush3.bf16.msra.mxu0 %v3585_v33 }
  0x1d   :  { %3065 = vmatprep.subr.bf16.mxu0 %v3586_v34 }
  0x20   :  { %3066 = vmatpush3.bf16.msra.mxu0 %v3587_v35 }
  0x91   :  { %v34_v10 = vpop.xlane.xlu0 %33 }
  0x92   :  { %v39_v11 = vmul.f32 0.00390625, %v34_v10 }
  0x94   :  { %v41_v12 = vsub.f32 %v28_v0, %v39_v11  ;;  %v42_v13 = vsub.f32 %v29_v1, %v39_v11  ;;  %v3843_v11 = vld [vmem:[%s4349_s1 + $0x8] sm:$0xff] }
  0x95   :  { %v37_v14 = vpop.xlane.xlu0 %36 }
  0x96   :  { %v40_v15 = vmul.f32 0.00390625, %v37_v14  ;;  %v45_v16 = vmul.f32 %v41_v12, %v41_v12  ;;  %v46_v17 = vmul.f32 %v42_v13, %v42_v13 }
  0x98   :  { %v43_v18 = vsub.f32 %v30_v2, %v40_v15  ;;  %v44_v19 = vsub.f32 %v31_v4, %v40_v15  ;;  %v49_v20 = vadd.f32 %v46_v17, %v45_v16 }
  0x9a   :  { %50 = vadd.xlane.f32.xlu1 %v49_v20  ;;  %v47_v21 = vmul.f32 %v43_v18, %v43_v18  ;;  %v48_v22 = vmul.f32 %v44_v19, %v44_v19  ;;  %v276_v20 = vsub.s32 2, %v3825_v51 }
  0x9c   :  { %v52_v23 = vadd.f32 %v48_v22, %v47_v21  ;;  %v277_v24 = vrot.slane %v3831_v53, %v276_v20 }
  0x9e   :  { %53 = vadd.xlane.f32.xlu1 %v52_v23 }
 0x127   :  { %v51_v36 = vpop.xlane.xlu1 %50 }
 0x128   :  { %v55_v37 = vmul.f32 0.00390625, %v51_v36 }
 0x12a   :  { %v57_v38 = vadd.f32 1e-05, %v55_v37 }
 0x12b   :  { %v54_v39 = vpop.xlane.xlu1 %53 }
 0x12c   :  { %v56_v40 = vmul.f32 0.00390625, %v54_v39  ;;  %3618 = vrsqrt.f32 %v57_v38 }
 0x12e   :  { %v58_v41 = vadd.f32 1e-05, %v56_v40 }
 0x130   :  { %3620 = vrsqrt.f32 %v58_v41 }
 0x136   :  { %v3619_v42 = vpop.eup %3618 }
 0x137   :  { %v62_v44 = vmul.f32 %v3619_v42, %v42_v13  ;;  %v61_v46 = vmul.f32 %v3619_v42, %v41_v12  ;;  %v3848_v12 = vld [vmem:[%s4349_s1] sm:$0xff] }
 0x13a   :  { %v3621_v43 = vpop.eup %3620 }
 0x13b   :  { %v64_v45 = vmul.f32 %v3621_v43, %v44_v19  ;;  %v63_v47 = vmul.f32 %v3621_v43, %v43_v18  ;;  %v270_v19 = vsub.s32 1, %v3825_v51 }
 0x13d   :  { %v66_v48 = vpack.c.bf16 %v64_v45, %v62_v44  ;;  %v65_v49 = vpack.c.bf16 %v63_v47, %v61_v46  ;;  %v271_v21 = vrot.slane %v3831_v53, %v270_v19 }
 0x13f   :  { %231 = vmatprep.mubr.bf16.mxu0 %v66_v48 }
 0x140   :  { %232 = vmatmul.mubr.bf16.vlgmr.msra.gmra.mrb[0].mxu0 %v65_v49  ;;  %v3588_v49 = vld [vmem:[%s4350_s3] sm:$0xff]  }
 0x141   :  { %3180 = vmatpush3.bf16.msra.mxu1 %v3588_v49 }
 0x142   :  { %3181 = vmatprep.subr.bf16.mxu1 %v3720_v50 }
 0x213   :  { %v3067_v54 = vpop.f32.mrb[0].mxu0 }
 0x214   :  { %v3068_v56 = vpop.f32.mrb[1].mxu0 }
 0x215   :  { %v3069_v57 = vadd.f32 %v3068_v56, %v3067_v54  ;;  %v3070_v58 = vpop.f32.mrb[2].mxu0  ;;  %v3589_v54 = vld [vmem:[%s4350_s3 + $0x8] sm:$0xff]  }
 0x216   :  { %v3071_v59 = vpop.f32.mrb[3].mxu0  ;;  %3182 = vmatpush3.bf16.msra.mxu1 %v3589_v54 }
 0x217   :  { %v3072_v60 = vadd.f32 %v3071_v59, %v3070_v58  ;;  %v234_v61 = vadd.f32 %v3069_v57, %v102_v55  ;;  %3187 = vmatprep.subr.bf16.mxu1 %v3720_v50 }
 0x219   :  { %v241_v62 = vsel %vm240_vm0, %v234_v61, 0.0  ;;  %v237_v63 = vadd.f32 %v3072_v60, %v102_v55 }
 0x21a   :  { %242 = vadd.xlane.f32.xlu0 %v241_v62 }
 0x21b   :  { %v244_v0 = vsel %vm240_vm0, %v237_v63, 0.0 }
 0x21c   :  { %245 = vadd.xlane.f32.xlu1 %v244_v0 }
 0x2a7   :  { %v243_v1 = vpop.xlane.xlu0 %242 }
 0x2a8   :  { %v248_v2 = vmul.f32 0.03125, %v243_v1 }
 0x2a9   :  { %v246_v3 = vpop.xlane.xlu1 %245 }
 0x2aa   :  { %v250_v4 = vsub.f32 %v234_v61, %v248_v2  ;;  %v249_v5 = vmul.f32 0.03125, %v246_v3  ;;  %v320_v61 = vsub.s32 3, %v3825_v51 }
 0x2ac   :  { %v251_v6 = vsub.f32 %v237_v63, %v249_v5  ;;  %v252_v7 = vmul.f32 %v250_v4, %v250_v4  ;;  %v321_v62 = vrot.slane %v3831_v53, %v320_v61  ;;  %v326_v63 = vsub.s32 4, %v3825_v51 }
 0x2ae   :  { %v254_v8 = vsel %vm240_vm0, %v252_v7, 0.0  ;;  %v253_v9 = vmul.f32 %v251_v6, %v251_v6  ;;  %v327_v5 = vrot.slane %v3831_v53, %v326_v63 }
 0x2af   :  { %255 = vadd.xlane.f32.xlu0 %v254_v8 }
 0x2b0   :  { %v257_v10 = vsel %vm240_vm0, %v253_v9, 0.0  ;;  %v3590_v9 = vld [vmem:[%s4350_s3 + $0x10] sm:$0xff]  }
 0x2b1   :  { %258 = vadd.xlane.f32.xlu1 %v257_v10 }
 0x2c2   :  { %284 = vrot.lane.b32.xlu1 %v3843_v11, %s3719_s16 }
 0x2c5   :  { %282 = vrot.lane.b32.xlu0 %v3848_v12, %s3719_s16 }
 0x33c   :  { %v256_v13 = vpop.xlane.xlu0 %255 }
 0x33d   :  { %v260_v14 = vmul.f32 0.03125, %v256_v13  ;;  %v3591_v13 = vld [vmem:[%s4350_s3 + $0x18] sm:$0xff]  }
 0x33e   :  { %v259_v15 = vpop.xlane.xlu1 %258 }
 0x33f   :  { %v262_v16 = vadd.f32 1e-05, %v260_v14  ;;  %v261_v17 = vmul.f32 0.03125, %v259_v15 }
 0x340   :  { %v283_v28 = vpop.permute.xlu0 %282 }
 0x341   :  { %3622 = vrsqrt.f32 %v262_v16  ;;  %v263_v18 = vadd.f32 1e-05, %v261_v17 }
 0x342   :  { %v285_v31 = vpop.permute.xlu1 %284 }
 0x343   :  { %3624 = vrsqrt.f32 %v263_v18 }
 0x34b   :  { %v3623_v22 = vpop.eup %3622 }
 0x34c   :  { %v266_v23 = vmul.f32 %v3623_v22, %v250_v4 }
 0x34d   :  { %v3625_v25 = vpop.eup %3624 }
 0x34e   :  { %v272_v26 = vmul.f32 %v271_v21, %v266_v23  ;;  %v267_v27 = vmul.f32 %v3625_v25, %v251_v6 }
 0x350   :  { %v278_v29 = vadd.f32 %v277_v24, %v272_v26  ;;  %v273_v30 = vmul.f32 %v271_v21, %v267_v27 }
 0x352   :  { %v288_v32 = vmul.f32 %v283_v28, %v278_v29  ;;  %v279_v33 = vadd.f32 %v277_v24, %v273_v30 }
 0x354   :  { %v3863_v34 = vadd.f32 %v288_v32, %v3848_v12  ;;  %v289_v35 = vmul.f32 %v285_v31, %v279_v33 }
 0x356   :  { %v3866_v36 = vadd.f32 %v289_v35, %v3843_v11  ;;  %v292_v37 = vsel %vm240_vm0, %v3863_v34, 0.0 }
 0x357   :  { %293 = vadd.xlane.f32.xlu1 %v292_v37 }
 0x358   :  { %v295_v38 = vsel %vm240_vm0, %v3866_v36, 0.0 }
 0x359   :  { %296 = vadd.xlane.f32.xlu0 %v295_v38 }
 0x3e4   :  { %v294_v39 = vpop.xlane.xlu1 %293 }
 0x3e5   :  { %v298_v40 = vmul.f32 0.03125, %v294_v39 }
 0x3e6   :  { %v297_v41 = vpop.xlane.xlu0 %296 }
 0x3e7   :  { %v300_v42 = vsub.f32 %v3863_v34, %v298_v40  ;;  %v299_v43 = vmul.f32 0.03125, %v297_v41 }
 0x3e9   :  { %v301_v44 = vsub.f32 %v3866_v36, %v299_v43  ;;  %v302_v45 = vmul.f32 %v300_v42, %v300_v42 }
 0x3eb   :  { %v304_v46 = vsel %vm240_vm0, %v302_v45, 0.0  ;;  %v303_v47 = vmul.f32 %v301_v44, %v301_v44 }
 0x3ec   :  { %305 = vadd.xlane.f32.xlu0 %v304_v46 }
 0x3ed   :  { %v307_v48 = vsel %vm240_vm0, %v303_v47, 0.0 }
 0x3ee   :  { %308 = vadd.xlane.f32.xlu1 %v307_v48 }
 0x479   :  { %v306_v55 = vpop.xlane.xlu0 %305 }
 0x47a   :  { %v310_v56 = vmul.f32 0.03125, %v306_v55 }
 0x47b   :  { %v309_v57 = vpop.xlane.xlu1 %308 }
 0x47c   :  { %v312_v58 = vadd.f32 1e-05, %v310_v56  ;;  %v311_v59 = vmul.f32 0.03125, %v309_v57 }
 0x47e   :  { %3626 = vrsqrt.f32 %v312_v58  ;;  %v313_v60 = vadd.f32 1e-05, %v311_v59 }
 0x480   :  { %3628 = vrsqrt.f32 %v313_v60 }
 0x488   :  { %v3627_v0 = vpop.eup %3626 }
 0x489   :  { %v316_v1 = vmul.f32 %v3627_v0, %v300_v42 }
 0x48a   :  { %v3629_v2 = vpop.eup %3628 }
 0x48b   :  { %v317_v3 = vmul.f32 %v3629_v2, %v301_v44  ;;  %v322_v4 = vmul.f32 %v321_v62, %v316_v1 }
 0x48d   :  { %v323_v6 = vmul.f32 %v321_v62, %v317_v3  ;;  %v328_v7 = vadd.f32 %v327_v5, %v322_v4 }
 0x48f   :  { %v329_v8 = vadd.f32 %v327_v5, %v323_v6 }
 0x491   :  { %v330_v10 = vpack.c.bf16 %v329_v8, %v328_v7 }
 0x493   :  { %3184 = vmatmul.mubr.msk.bf16.vlgmr.msra.gmra.mrb[0].mxu1 %vm240_vm0, %v330_v10 }
 0x494   :  { %3188 = vmatpush3.bf16.msra.mxu1 %v3590_v9  ;;  %3191 = vmatprep.mubr.msk.bf16.mxu1 %vm3721_vm1, %v3720_v50 }
 0x495   :  { %3189 = vmatprep.subr.bf16.mxu1 %v3720_v50 }
 0x498   :  { %3190 = vmatpush3.bf16.msra.mxu1 %v3591_v13 }
 0x49b   :  { %3192 = vmatmul.mubr.msk.bf16.vlgmr.msra.gmra.mrb[4].mxu1 %vm240_vm0, %v330_v10 }
 0x566   :  { %v384_v14 = vpop.f32.mrb[0].mxu1 }
 0x567   :  { %858 = vrot.lane.b32.xlu1 %v384_v14, %s3722_s24  ;;  %v3185_v15 = vpop.f32.mrb[1].mxu1  ;;  %3199 = vmatprep.mubr.msk.f32.mxu1 %vm454_vm2, %v384_v14 }
 0x568   :  { %v3908_v16 = vpop.f32.mrb[2].mxu1 }
 0x569   :  { %v3186_v17 = vpop.f32.mrb[3].mxu1  ;;  %v3911_v18 = vpack.i.bf16 %v3908_v16, %v384_v14 }
 0x56b   :  { %860 = vrot.lane.b32.xlu1 %v3908_v16, %s3722_s24  ;;  %3503 = vrot.lane.b32.xlu0 %v3911_v18, %s3723_s25 }
 0x56e   :  { %v441_v21 = vpop.f32.mrb[4].mxu1 }
 0x56f   :  { %v3193_v22 = vpop.f32.mrb[5].mxu1  ;;  %542 = vrot.lane.b32.xlu0 %v3843_v11, %s3724_s26  ;;  %540 = vrot.lane.b32.xlu1 %v3848_v12, %s3724_s26 }
 0x570   :  { %v444_v23 = vpop.f32.mrb[6].mxu1 }
 0x571   :  { %v3194_v24 = vpop.f32.mrb[7].mxu1  ;;  %v3921_v25 = vpack.i.bf16 %v444_v23, %v441_v21  ;;  %v3923_v26 = vpack.c.bf16 %v444_v23, %v441_v21 }
 0x5d9   :  { %v859_v27 = vpop.permute.xlu1 %858 }
 0x5da   :  { %3227 = vmatprep.mubr.msk.f32.mxu0 %vm454_vm2, %v859_v27 }
 0x5dd   :  { %v3504_v28 = vpop.permute.xlu0 %3503  ;;  %v861_v12 = vpop.permute.xlu1 %860 }
 0x5de   :  { %v3506_v29 = vunpack.i.h.bf16 %v3504_v28  ;;  %v3505_v30 = vunpack.i.l.bf16 %v3504_v28 }
 0x5e0   :  { %v3419_v11 = vpack.c.bf16 %v3506_v29, %v3505_v30 }
 0x5e1   :  { %v3937_v33 = vpop.permute.xlu0 %542  ;;  %v3939_v38 = vpop.permute.xlu1 %540 }
 0x5e2   :  { %3421 = vmatprep.subr.msk.bf16.mxu0 %vm3928_vm3, %v3419_v11 }
 0x5e3   :  { %3424 = vmatpush3.bf16.xpose.msk.msra.mxu0 %vm3928_vm3, %v3419_v11 }
 0x5ea   :  { %3228 = vmatmul.mubr.msk.f32.vlgmr.msra.gmra.mrb[4].mxu0 %vm454_vm2, %v861_v12 }
 0x6bd   :  { %v3229_v32 = vpop.f32.mrb[4].mxu0 }
 0x6be   :  { %v950_v35 = vmul.f32 0.35355338, %v3229_v32  ;;  %v940_v37 = vpop.f32.mrb[5].mxu0 }
 0x6bf   :  { %v949_v39 = vmul.f32 0.35355338, %v940_v37 }
 0x6c0   :  { %v952_v40 = vadd.f32 %v950_v35, %v3937_v33 }
 0x6c1   :  { %v951_v41 = vadd.f32 %v949_v39, %v3939_v38 }
 0x6c2   :  { %v956_v42 = vsel %vm548_vm4, %v952_v40, -inf }
 0x6c3   :  { %957 = vmax.xlane.f32.xlu0 %v956_v42  ;;  %v953_v43 = vsel %vm548_vm4, %v951_v41, -inf }
 0x6c4   :  { %954 = vmax.xlane.f32.xlu1 %v953_v43 }
 0x6d5   :  { %3508 = vrot.lane.b32.xlu1 %v3911_v18, %s3719_s16 }
 0x6d9   :  { %3513 = vrot.lane.b32.xlu0 %v3911_v18, %s3725_s27  ;;  %3518 = vrot.lane.b32.xlu1 %v3921_v25, %s3724_s26 }
 0x6dd   :  { %571 = vrot.lane.b32.xlu1 %v384_v14, %s3726_s28 }
 0x6e1   :  { %573 = vrot.lane.b32.xlu1 %v3908_v16, %s3726_s28 }
 0x6e5   :  { %1064 = vrot.lane.b32.xlu1 %v384_v14, %s3727_s29 }
 0x750   :  { %v958_v44 = vpop.xlane.xlu0 %957 }
 0x751   :  { %v960_v45 = vsub.f32 %v952_v40, %v958_v44  ;;  %v955_v46 = vpop.xlane.xlu1 %954 }
 0x752   :  { %v959_v47 = vsub.f32 %v951_v41, %v955_v46 }
 0x753   :  { %v963_v48 = vmul.f32 1.442695, %v960_v45 }
 0x754   :  { %v961_v49 = vmul.f32 1.442695, %v959_v47  ;;  %v3514_v54 = vpop.permute.xlu0 %3513 }
 0x755   :  { %3630 = vpow2.f32 %v963_v48  ;;  %v3509_v55 = vpop.permute.xlu1 %3508  ;;  %v3516_v56 = vunpack.i.h.bf16 %v3514_v54  ;;  %v3515_v57 = vunpack.i.l.bf16 %v3514_v54 }
 0x756   :  { %v3511_v58 = vunpack.i.h.bf16 %v3509_v55  ;;  %v3510_v59 = vunpack.i.l.bf16 %v3509_v55  ;;  %3632 = vpow2.f32 %v961_v49 }
 0x757   :  { %v3405_v0 = vpack.c.bf16 %v3516_v56, %v3515_v57 }
 0x758   :  { %v3399_v60 = vpack.c.bf16 %v3511_v58, %v3510_v59 }
 0x759   :  { %v3519_v62 = vpop.permute.xlu1 %3518 }
 0x75a   :  { %v3521_v1 = vunpack.i.h.bf16 %v3519_v62  ;;  %v3520_v2 = vunpack.i.l.bf16 %v3519_v62  ;;  %3401 = vmatprep.subr.msk.bf16.mxu1 %vm3928_vm3, %v3399_v60 }
 0x75b   :  { %3404 = vmatpush3.bf16.xpose.msk.msra.mxu1 %vm3928_vm3, %v3399_v60 }
 0x75c   :  { %v3425_v3 = vpack.c.bf16 %v3521_v1, %v3520_v2  ;;  %3407 = vmatprep.subr.msk.bf16.mxu1 %vm3928_vm3, %v3405_v0 }
 0x75d   :  { %v572_v7 = vpop.permute.xlu1 %571 }
 0x75e   :  { %3426 = vmatprep.subr.bf16.mxu0 %v3425_v3 }
 0x75f   :  { %v3631_v4 = vpop.eup %3630  ;;  %3428 = vmatpush3.bf16.msra.mxu0 %v3425_v3 }
 0x760   :  { %v968_v5 = vsel %vm548_vm4, %v3631_v4, 0.0  ;;  %v3633_v6 = vpop.eup %3632 }
 0x761   :  { %969 = vadd.xlane.f32.xlu0 %v968_v5  ;;  %v965_v8 = vsel %vm548_vm4, %v3633_v6, 0.0  ;;  %v574_v9 = vpop.permute.xlu1 %573 }
 0x762   :  { %3200 = vmatmul.mubr.msk.f32.vlgmr.msra.gmra.mrb[8].mxu1 %vm454_vm2, %v3908_v16 }
 0x763   :  { %3410 = vmatpush3.bf16.xpose.msk.msra.mxu1 %vm3928_vm3, %v3405_v0  ;;  %3206 = vmatprep.mubr.msk.f32.mxu1 %vm454_vm2, %v572_v7 }
 0x765   :  { %966 = vadd.xlane.f32.xlu0 %v965_v8 }
 0x76a   :  { %3207 = vmatmul.mubr.msk.f32.vlgmr.msra.gmra.mrb[10].mxu1 %vm454_vm2, %v574_v9 }
 0x77b   :  { %3523 = vrot.lane.b32.xlu0 %v3911_v18, %s3728_s30  ;;  %v1065_v18 = vpop.permute.xlu1 %1064 }
 0x77f   :  { %1066 = vrot.lane.b32.xlu0 %v3908_v16, %s3727_s29 }
 0x7ee   :  { %v970_v10 = vpop.xlane.xlu0 %969 }
 0x7ef   :  { %3634 = vrcp.f32 %v970_v10 }
 0x7f2   :  { %v967_v13 = vpop.xlane.xlu0 %966 }
 0x7f3   :  { %3636 = vrcp.f32 %v967_v13 }
 0x7f6   :  { %v3524_v14 = vpop.permute.xlu0 %3523 }
 0x7f7   :  { %v3526_v15 = vunpack.i.h.bf16 %v3524_v14  ;;  %v3525_v17 = vunpack.i.l.bf16 %v3524_v14 }
 0x7f9   :  { %v3429_v21 = vpack.c.bf16 %v3526_v15, %v3525_v17  ;;  %v3635_v22 = vpop.eup %3634 }
 0x7fa   :  { %v974_v27 = vmul.f32 %v3635_v22, %v3631_v4  ;;  %v1067_v16 = vpop.permute.xlu0 %1066 }
 0x7fb   :  { %3431 = vmatprep.subr.msk.bf16.mxu0 %vm3928_vm3, %v3429_v21 }
 0x7fd   :  { %v3637_v23 = vpop.eup %3636 }
 0x7fe   :  { %v973_v24 = vmul.f32 %v3637_v23, %v3633_v6 }
 0x800   :  { %3234 = vmatprep.mubr.msk.f32.mxu0 %vm548_vm4, %v973_v24 }
 0x801   :  { %3235 = vmatmul.mubr.msk.f32.vlgmr.msra.gmra.mrb[6].mxu0 %vm548_vm4, %v974_v27 }
 0x802   :  { %3434 = vmatpush3.bf16.xpose.msk.msra.mxu0 %vm3928_vm3, %v3429_v21  ;;  %3241 = vmatprep.mubr.msk.f32.mxu0 %vm454_vm2, %v1065_v18 }
 0x803   :  { %3251 = vmatprep.subr.bf16.mxu0 %v3720_v50 }
 0x809   :  { %3242 = vmatmul.mubr.msk.f32.vlgmr.msra.gmra.mrb[8].mxu0 %vm454_vm2, %v1067_v16 }
 0x80a   :  { %3255 = vmatprep.mubr.msk.bf16.mxu0 %vm3721_vm1, %v3720_v50 }
 0x835   :  { %v3201_v28 = vpop.f32.mrb[8].mxu1 }
 0x836   :  { %v529_v29 = vpop.f32.mrb[9].mxu1  ;;  %v539_v40 = vmul.f32 0.35355338, %v3201_v28 }
 0x837   :  { %v538_v11 = vmul.f32 0.35355338, %v529_v29 }
 0x838   :  { %v547_v45 = vadd.f32 %v3937_v33, %v539_v40 }
 0x839   :  { %v546_v42 = vadd.f32 %v3939_v38, %v538_v11 }
 0x83a   :  { %v552_v46 = vsel %vm548_vm4, %v547_v45, -inf }
 0x83b   :  { %v549_v44 = vsel %vm548_vm4, %v546_v42, -inf }
 0x83d   :  { %v3208_v30 = vpop.f32.mrb[10].mxu1 }
 0x83e   :  { %v663_v12 = vmul.f32 0.35355338, %v3208_v30  ;;  %v653_v32 = vpop.f32.mrb[11].mxu1 }
 0x83f   :  { %v662_v35 = vmul.f32 0.35355338, %v653_v32 }
 0x840   :  { %v665_v37 = vadd.f32 %v663_v12, %v3937_v33 }
 0x841   :  { %v664_v39 = vadd.f32 %v662_v35, %v3939_v38 }
 0x842   :  { %v669_v41 = vsel %vm548_vm4, %v665_v37, -inf }
 0x843   :  { %670 = vmax.xlane.f32.xlu0 %v669_v41  ;;  %v666_v43 = vsel %vm548_vm4, %v664_v39, -inf }
 0x844   :  { %667 = vmax.xlane.f32.xlu1 %v666_v43 }
 0x847   :  { %550 = vmax.xlane.f32.xlu0 %v549_v44 }
 0x84b   :  { %553 = vmax.xlane.f32.xlu0 %v552_v46 }
 0x8d0   :  { %v671_v47 = vpop.xlane.xlu0 %670 }
 0x8d1   :  { %v673_v48 = vsub.f32 %v665_v37, %v671_v47  ;;  %v668_v49 = vpop.xlane.xlu1 %667 }
 0x8d2   :  { %v672_v54 = vsub.f32 %v664_v39, %v668_v49 }
 0x8d3   :  { %v676_v55 = vmul.f32 1.442695, %v673_v48 }
 0x8d4   :  { %v3992_v56 = vpop.f32.mrb[6].mxu0  ;;  %v551_v57 = vpop.xlane.xlu0 %550  ;;  %v674_v58 = vmul.f32 1.442695, %v672_v54 }
 0x8d5   :  { %v555_v59 = vsub.f32 %v546_v42, %v551_v57  ;;  %v3994_v60 = vpop.f32.mrb[7].mxu0  ;;  %3638 = vpow2.f32 %v676_v55 }
 0x8d6   :  { %3640 = vpow2.f32 %v674_v58 }
 0x8d7   :  { %v557_v62 = vmul.f32 1.442695, %v555_v59 }
 0x8d8   :  { %v554_v0 = vpop.xlane.xlu0 %553 }
 0x8d9   :  { %v556_v1 = vsub.f32 %v547_v45, %v554_v0  ;;  %3642 = vpow2.f32 %v557_v62 }
 0x8db   :  { %v559_v2 = vmul.f32 1.442695, %v556_v1 }
 0x8dc   :  { %v3243_v3 = vpop.f32.mrb[8].mxu0 }
 0x8dd   :  { %3644 = vpow2.f32 %v559_v2  ;;  %v1156_v4 = vmul.f32 0.35355338, %v3243_v3  ;;  %v1146_v5 = vpop.f32.mrb[9].mxu0 }
 0x8de   :  { %v1155_v6 = vmul.f32 0.35355338, %v1146_v5 }
 0x8df   :  { %v1158_v7 = vadd.f32 %v1156_v4, %v3937_v33  ;;  %v3639_v10 = vpop.eup %3638 }
 0x8e0   :  { %v1157_v8 = vadd.f32 %v1155_v6, %v3939_v38  ;;  %v3641_v14 = vpop.eup %3640  ;;  %v681_v15 = vsel %vm548_vm4, %v3639_v10, 0.0 }
 0x8e1   :  { %v1162_v9 = vsel %vm548_vm4, %v1158_v7, -inf  ;;  %v678_v21 = vsel %vm548_vm4, %v3641_v14, 0.0 }
 0x8e2   :  { %1163 = vmax.xlane.f32.xlu0 %v1162_v9  ;;  %v1159_v13 = vsel %vm548_vm4, %v1157_v8, -inf  ;;  %v1274_v9 = vsub.s32 5, %v3825_v51 }
 0x8e3   :  { %1160 = vmax.xlane.f32.xlu1 %v1159_v13  ;;  %v3643_v17 = vpop.eup %3642 }
 0x8e4   :  { %v561_v24 = vsel %vm548_vm4, %v3643_v17, 0.0 }
 0x8e6   :  { %682 = vadd.xlane.f32.xlu0 %v681_v15  ;;  %v1275_v15 = vrot.slane %v3831_v53, %v1274_v9 }
 0x8e7   :  { %v3645_v22 = vpop.eup %3644  ;;  %679 = vadd.xlane.f32.xlu1 %v678_v21 }
 0x8e8   :  { %v564_v23 = vsel %vm548_vm4, %v3645_v22, 0.0 }
 0x8ea   :  { %565 = vadd.xlane.f32.xlu0 %v564_v23 }
 0x8eb   :  { %562 = vadd.xlane.f32.xlu1 %v561_v24 }
 0x96f   :  { %v1164_v27 = vpop.xlane.xlu0 %1163 }
 0x970   :  { %v1166_v18 = vsub.f32 %v1158_v7, %v1164_v27  ;;  %v1161_v16 = vpop.xlane.xlu1 %1160 }
 0x971   :  { %v1165_v28 = vsub.f32 %v1157_v8, %v1161_v16 }
 0x972   :  { %v1169_v29 = vmul.f32 1.442695, %v1166_v18 }
 0x973   :  { %v1167_v30 = vmul.f32 1.442695, %v1165_v28  ;;  %v683_v41 = vpop.xlane.xlu0 %682 }
 0x974   :  { %3646 = vpow2.f32 %v1169_v29  ;;  %v680_v11 = vpop.xlane.xlu1 %679 }
 0x975   :  { %3648 = vpow2.f32 %v1167_v30 }
 0x976   :  { %3650 = vrcp.f32 %v680_v11 }
 0x977   :  { %v566_v42 = vpop.xlane.xlu0 %565  ;;  %3652 = vrcp.f32 %v683_v41 }
 0x978   :  { %v563_v43 = vpop.xlane.xlu1 %562 }
 0x979   :  { %3654 = vrcp.f32 %v563_v43 }
 0x97a   :  { %3656 = vrcp.f32 %v566_v42 }
 0x97e   :  { %v3647_v12 = vpop.eup %3646 }
 0x97f   :  { %v3649_v32 = vpop.eup %3648  ;;  %v1174_v35 = vsel %vm548_vm4, %v3647_v12, 0.0 }
 0x980   :  { %1175 = vadd.xlane.f32.xlu0 %v1174_v35  ;;  %v1171_v37 = vsel %vm548_vm4, %v3649_v32, 0.0  ;;  %v3651_v39 = vpop.eup %3650  ;;  %v3592_v35 = vld [vmem:[%s4350_s3 + $0x20] sm:$0xff]  }
 0x981   :  { %1172 = vadd.xlane.f32.xlu1 %v1171_v37  ;;  %v686_v40 = vmul.f32 %v3651_v39, %v3641_v14  ;;  %v3653_v55 = vpop.eup %3652  ;;  %3252 = vmatpush3.bf16.msra.mxu0 %v3592_v35  ;;  %v3593_v37 = vld [vmem:[%s4350_s3 + $0x28] sm:$0xff]  }
 0x982   :  { %3253 = vmatprep.subr.bf16.mxu0 %v3720_v50 }
 0x983   :  { %3213 = vmatprep.mubr.msk.f32.mxu1 %vm548_vm4, %v686_v40  ;;  %v3655_v57 = vpop.eup %3654 }
 0x984   :  { %v569_v62 = vmul.f32 %v3655_v57, %v3643_v17  ;;  %v3657_v1 = vpop.eup %3656  ;;  %v3596_v57 = vld [vmem:[%s4351_s4 + $0x10] sm:$0xff]  }
 0x985   :  { %v570_v3 = vmul.f32 %v3657_v1, %v3645_v22  ;;  %3254 = vmatpush3.bf16.msra.mxu0 %v3593_v37 }
 0x986   :  { %3271 = vmatprep.subr.bf16.mxu0 %v3720_v50 }
 0x992   :  { %3528 = vrot.lane.b32.xlu1 %v3921_v25, %s3719_s16 }
 0x996   :  { %3533 = vrot.lane.b32.xlu0 %v3921_v25, %s3729_s7  ;;  %v687_v25 = vmul.f32 %v3653_v55, %v3639_v10  ;;  %v3595_v55 = vld [vmem:[%s4351_s4 + $0x8] sm:$0xff]  }
 0xa0d   :  { %v1176_v44 = vpop.xlane.xlu0 %1175 }
 0xa0e   :  { %v1173_v45 = vpop.xlane.xlu1 %1172 }
 0xa0f   :  { %3658 = vrcp.f32 %v1173_v45 }
 0xa10   :  { %3660 = vrcp.f32 %v1176_v44 }
 0xa11   :  { %v3534_v49 = vpop.permute.xlu0 %3533 }
 0xa12   :  { %v3529_v46 = vpop.permute.xlu1 %3528  ;;  %v3536_v58 = vunpack.i.h.bf16 %v3534_v49  ;;  %v3535_v59 = vunpack.i.l.bf16 %v3534_v49 }
 0xa13   :  { %v3531_v47 = vunpack.i.h.bf16 %v3529_v46  ;;  %v3530_v48 = vunpack.i.l.bf16 %v3529_v46 }
 0xa14   :  { %v3435_v0 = vpack.c.bf16 %v3536_v58, %v3535_v59  ;;  %v3597_v58 = vld [vmem:[%s4351_s4 + $0x18] sm:$0xff]   ;;  %v1311_v59 = vsub.s32 6, %v3825_v51 }
 0xa15   :  { %v3411_v54 = vpack.c.bf16 %v3531_v47, %v3530_v48 }
 0xa17   :  { %3412 = vmatprep.subr.bf16.mxu1 %v3411_v54 }
 0xa18   :  { %3414 = vmatpush3.bf16.msra.mxu1 %v3411_v54  ;;  %v3594_v54 = vld [vmem:[%s4351_s4] sm:$0xff]  }
 0xa19   :  { %3416 = vmatprep.subr.bf16.mxu1 %v3923_v26  ;;  %v3659_v2 = vpop.eup %3658 }
 0xa1a   :  { %v3661_v4 = vpop.eup %3660  ;;  %v1179_v5 = vmul.f32 %v3659_v2, %v3649_v32 }
 0xa1b   :  { %3214 = vmatmul.mubr.msk.f32.vlgmr.msra.gmra.mrb[12].mxu1 %vm548_vm4, %v687_v25  ;;  %v1180_v6 = vmul.f32 %v3661_v4, %v3647_v12  ;;  %v1312_v25 = vrot.slane %v3831_v53, %v1311_v59 }
 0xa1c   :  { %3418 = vmatpush3.bf16.msra.mxu1 %v3923_v26  ;;  %3220 = vmatprep.mubr.msk.f32.mxu1 %vm548_vm4, %v569_v62 }
 0xa1d   :  { %3436 = vmatprep.subr.bf16.mxu1 %v3435_v0 }
 0xa23   :  { %3221 = vmatmul.mubr.msk.f32.vlgmr.msra.gmra.mrb[12].mxu1 %vm548_vm4, %v570_v3 }
 0xa24   :  { %3438 = vmatpush3.bf16.msra.mxu1 %v3435_v0  ;;  %3248 = vmatprep.mubr.msk.f32.mxu1 %vm548_vm4, %v1179_v5 }
 0xa25   :  { %3259 = vmatprep.subr.bf16.mxu1 %v3720_v50 }
 0xa27   :  { %3249 = vmatmul.mubr.msk.f32.vlgmr.msra.gmra.mrb[14].mxu1 %vm548_vm4, %v1180_v6 }
 0xa28   :  { %3267 = vmatprep.mubr.msk.bf16.mxu1 %vm3721_vm1, %v3720_v50  ;;  %3260 = vmatpush3.bf16.msra.mxu1 %v3594_v54 }
 0xa29   :  { %3261 = vmatprep.subr.bf16.mxu1 %v3720_v50 }
 0xa2c   :  { %3262 = vmatpush3.bf16.msra.mxu1 %v3595_v55  ;;  %v3598_v55 = vld [vmem:[%s4350_s3 + $0x30] sm:$0xff]  }
 0xa2d   :  { %3263 = vmatprep.subr.bf16.mxu1 %v3720_v50 }
 0xa30   :  { %3264 = vmatpush3.bf16.msra.mxu1 %v3596_v57  ;;  %v3599_v57 = vld [vmem:[%s4350_s3 + $0x38] sm:$0xff]  }
 0xa31   :  { %3265 = vmatprep.subr.bf16.mxu1 %v3720_v50 }
 0xa34   :  { %3266 = vmatpush3.bf16.msra.mxu1 %v3597_v58 }
 0xaf6   :  { %v3222_v26 = vpop.f32.mrb[12].mxu1 }
 0xaf7   :  { %v3479_v7 = vadd.f32 %v3992_v56, %v3222_v26  ;;  %v849_v8 = vpop.f32.mrb[13].mxu1 }
 0xaf8   :  { %v3481_v10 = vadd.f32 %v3994_v60, %v849_v8 }
 0xafa   :  { %v3250_v13 = vpop.f32.mrb[14].mxu1 }
 0xafb   :  { %v3480_v14 = vadd.f32 %v3479_v7, %v3250_v13  ;;  %v1259_v17 = vpop.f32.mrb[15].mxu1 }
 0xafc   :  { %v3482_v21 = vadd.f32 %v3481_v10, %v1259_v17 }
 0xafd   :  { %v1271_v22 = vadd.f32 %v3480_v14, %v3866_v36 }
 0xafe   :  { %v1270_v23 = vadd.f32 %v3482_v21, %v3863_v34 }
 0xaff   :  { %v4029_v24 = vadd.f32 %v1275_v15, %v1271_v22 }
 0xb00   :  { %v4031_v56 = vadd.f32 %v1275_v15, %v1270_v23 }
 0xb01   :  { %v1281_v27 = vsel %vm240_vm0, %v4029_v24, 0.0 }
 0xb02   :  { %1282 = vadd.xlane.f32.xlu0 %v1281_v27  ;;  %v1278_v60 = vsel %vm240_vm0, %v4031_v56, 0.0 }
 0xb03   :  { %1279 = vadd.xlane.f32.xlu1 %v1278_v60 }
 0xb8f   :  { %v1283_v18 = vpop.xlane.xlu0 %1282 }
 0xb90   :  { %v1285_v16 = vmul.f32 0.03125, %v1283_v18  ;;  %v1280_v28 = vpop.xlane.xlu1 %1279 }
 0xb91   :  { %v1284_v29 = vmul.f32 0.03125, %v1280_v28 }
 0xb92   :  { %v1287_v36 = vsub.f32 %v4029_v24, %v1285_v16 }
 0xb93   :  { %v1286_v34 = vsub.f32 %v4031_v56, %v1284_v29  ;;  %v1398_v29 = vsub.s32 7, %v3825_v51 }
 0xb94   :  { %v1289_v30 = vmul.f32 %v1287_v36, %v1287_v36 }
 0xb95   :  { %v1288_v11 = vmul.f32 %v1286_v34, %v1286_v34 }
 0xb96   :  { %v1293_v12 = vsel %vm240_vm0, %v1289_v30, 0.0 }
 0xb97   :  { %1294 = vadd.xlane.f32.xlu0 %v1293_v12  ;;  %v1290_v32 = vsel %vm240_vm0, %v1288_v11, 0.0 }
 0xb98   :  { %1291 = vadd.xlane.f32.xlu1 %v1290_v32 }
 0xc24   :  { %v1295_v39 = vpop.xlane.xlu0 %1294 }
 0xc25   :  { %v1297_v40 = vmul.f32 0.03125, %v1295_v39  ;;  %v1292_v41 = vpop.xlane.xlu1 %1291 }
 0xc26   :  { %v1296_v42 = vmul.f32 0.03125, %v1292_v41 }
 0xc27   :  { %v1299_v43 = vadd.f32 1e-05, %v1297_v40 }
 0xc28   :  { %v1298_v44 = vadd.f32 1e-05, %v1296_v42 }
 0xc29   :  { %3662 = vrsqrt.f32 %v1299_v43 }
 0xc2a   :  { %3664 = vrsqrt.f32 %v1298_v44 }
 0xc33   :  { %v3663_v45 = vpop.eup %3662 }
 0xc34   :  { %v3665_v46 = vpop.eup %3664  ;;  %v1303_v47 = vmul.f32 %v3663_v45, %v1287_v36  ;;  %v3718_v36 = vld [vmem:[%s4348_s5] sm:$0xff] }
 0xc35   :  { %v1302_v48 = vmul.f32 %v3665_v46, %v1286_v34  ;;  %v1399_v34 = vrot.slane %v3718_v36, %v1398_v29 }
 0xc37   :  { %v1304_v49 = vpack.c.bf16 %v1303_v47, %v1302_v48 }
 0xc39   :  { %3256 = vmatmul.mubr.msk.bf16.vlgmr.msra.gmra.mrb[12].mxu0 %vm240_vm0, %v1304_v49 }
 0xc3a   :  { %3275 = vmatprep.mubr.msk.bf16.mxu0 %vm3721_vm1, %v3720_v50  ;;  %3272 = vmatpush3.bf16.msra.mxu0 %v3598_v55 }
 0xc3b   :  { %3273 = vmatprep.subr.bf16.mxu0 %v3720_v50 }
 0xc3e   :  { %3274 = vmatpush3.bf16.msra.mxu0 %v3599_v57 }
 0xc3f   :  { %3279 = vmatprep.subr.bf16.mxu0 %v3720_v50 }
 0xd0c   :  { %v1362_v62 = vpop.f32.mrb[12].mxu0 }
 0xd0d   :  { %v1363_v0 = vadd.f32 %v1362_v62, %v1312_v25  ;;  %v3257_v1 = vpop.f32.mrb[13].mxu0 }
 0xd0e   :  { %v1365_v2 = vpop.f32.mrb[14].mxu0 }
 0xd0f   :  { %v1371_v3 = vmul.f32 0.044715, %v1363_v0  ;;  %v1366_v4 = vadd.f32 %v1365_v2, %v1312_v25  ;;  %v3258_v5 = vpop.f32.mrb[15].mxu0  ;;  %v1369_v23 = vmul.f32 0.5, %v1363_v0 }
 0xd11   :  { %v1373_v6 = vmul.f32 %v1371_v3, %v1363_v0  ;;  %v1372_v26 = vmul.f32 0.044715, %v1366_v4  ;;  %v1370_v27 = vmul.f32 0.5, %v1366_v4  ;;  %v4103_v3 = vld [vmem:[%s4348_s5 + $0x8] sm:$0xff] }
 0xd13   :  { %v1375_v7 = vmul.f32 %v1373_v6, %v1363_v0  ;;  %v1374_v8 = vmul.f32 %v1372_v26, %v1366_v4  ;;  %v1506_v6 = vrot.slane %v4103_v3, %v270_v19 }
 0xd15   :  { %v1377_v10 = vadd.f32 %v1375_v7, %v1363_v0  ;;  %v1376_v13 = vmul.f32 %v1374_v8, %v1366_v4 }
 0xd17   :  { %v1379_v14 = vmul.f32 0.7978846, %v1377_v10  ;;  %v1378_v15 = vadd.f32 %v1376_v13, %v1366_v4  ;;  %v1500_v4 = vrot.slane %v4103_v3, %v101_v52  ;;  %v3601_v52 = vld [vmem:[%s4350_s3 + $0x48] sm:$0xff]  }
 0xd19   :  { %3666 = vtanh.f32 %v1379_v14  ;;  %v1380_v17 = vmul.f32 0.7978846, %v1378_v15 }
 0xd1b   :  { %3668 = vtanh.f32 %v1380_v17  ;;  %v3600_v17 = vld [vmem:[%s4350_s3 + $0x40] sm:$0xff]  }
 0xd23   :  { %v3667_v21 = vpop.eup %3666 }
 0xd24   :  { %v1383_v53 = vadd.f32 1.0, %v3667_v21 }
 0xd25   :  { %v3669_v22 = vpop.eup %3668 }
 0xd26   :  { %v1384_v60 = vadd.f32 1.0, %v3669_v22  ;;  %v1385_v18 = vmul.f32 %v1383_v53, %v1369_v23 }
 0xd28   :  { %v1386_v16 = vmul.f32 %v1384_v60, %v1370_v27 }
 0xd2a   :  { %v1387_v28 = vpack.c.bf16 %v1386_v16, %v1385_v18 }
 0xd2c   :  { %3268 = vmatmul.mubr.msk.bf16.vlgmr.msra.gmra.mrb[16].mxu1 %vm1424_vm5, %v1387_v28 }
 0xdff   :  { %v1462_v30 = vpop.f32.mrb[16].mxu1 }
 0xe00   :  { %v1463_v11 = vadd.f32 %v1462_v30, %v1399_v34  ;;  %v3269_v12 = vpop.f32.mrb[17].mxu1 }
 0xe01   :  { %v1465_v32 = vpop.f32.mrb[18].mxu1 }
 0xe02   :  { %v4079_v35 = vadd.f32 %v1463_v11, %v4031_v56  ;;  %v1466_v37 = vadd.f32 %v1465_v32, %v1399_v34  ;;  %v3270_v39 = vpop.f32.mrb[19].mxu1 }
 0xe04   :  { %v4082_v40 = vadd.f32 %v1466_v37, %v4029_v24  ;;  %v1471_v41 = vsel %vm240_vm0, %v4079_v35, 0.0 }
 0xe05   :  { %1472 = vadd.xlane.f32.xlu1 %v1471_v41 }
 0xe06   :  { %v1474_v42 = vsel %vm240_vm0, %v4082_v40, 0.0 }
 0xe07   :  { %1475 = vadd.xlane.f32.xlu0 %v1474_v42 }
 0xe92   :  { %v1473_v43 = vpop.xlane.xlu1 %1472 }
 0xe93   :  { %v1477_v44 = vmul.f32 0.03125, %v1473_v43 }
 0xe94   :  { %v1476_v45 = vpop.xlane.xlu0 %1475 }
 0xe95   :  { %v1479_v46 = vsub.f32 %v4079_v35, %v1477_v44  ;;  %v1478_v56 = vmul.f32 0.03125, %v1476_v45 }
 0xe97   :  { %v1480_v47 = vsub.f32 %v4082_v40, %v1478_v56  ;;  %v1481_v48 = vmul.f32 %v1479_v46, %v1479_v46 }
 0xe99   :  { %v1483_v24 = vsel %vm240_vm0, %v1481_v48, 0.0  ;;  %v1482_v49 = vmul.f32 %v1480_v47, %v1480_v47 }
 0xe9a   :  { %1484 = vadd.xlane.f32.xlu1 %v1483_v24 }
 0xe9b   :  { %v1486_v54 = vsel %vm240_vm0, %v1482_v49, 0.0 }
 0xe9c   :  { %1487 = vadd.xlane.f32.xlu0 %v1486_v54 }
 0xf27   :  { %v1485_v58 = vpop.xlane.xlu1 %1484 }
 0xf28   :  { %v1489_v25 = vmul.f32 0.03125, %v1485_v58 }
 0xf29   :  { %v1488_v62 = vpop.xlane.xlu0 %1487 }
 0xf2a   :  { %v1491_v0 = vadd.f32 1e-05, %v1489_v25  ;;  %v1490_v1 = vmul.f32 0.03125, %v1488_v62 }
 0xf2c   :  { %3670 = vrsqrt.f32 %v1491_v0  ;;  %v1492_v2 = vadd.f32 1e-05, %v1490_v1 }
 0xf2e   :  { %3672 = vrsqrt.f32 %v1492_v2 }
 0xf36   :  { %v3671_v5 = vpop.eup %3670 }
 0xf37   :  { %v1495_v26 = vmul.f32 %v3671_v5, %v1479_v46 }
 0xf38   :  { %v3673_v7 = vpop.eup %3672 }
 0xf39   :  { %v1501_v8 = vmul.f32 %v1500_v4, %v1495_v26  ;;  %v1496_v10 = vmul.f32 %v3673_v7, %v1480_v47 }
 0xf3b   :  { %v1502_v13 = vmul.f32 %v1500_v4, %v1496_v10  ;;  %v1507_v14 = vadd.f32 %v1506_v6, %v1501_v8 }
 0xf3d   :  { %v1508_v15 = vadd.f32 %v1506_v6, %v1502_v13 }
 0xf3f   :  { %v1509_v21 = vpack.c.bf16 %v1508_v15, %v1507_v14 }
 0xf41   :  { %3276 = vmatmul.mubr.msk.bf16.vlgmr.msra.gmra.mrb[16].mxu0 %vm240_vm0, %v1509_v21 }
 0xf42   :  { %3280 = vmatpush3.bf16.msra.mxu0 %v3600_v17  ;;  %3283 = vmatprep.mubr.msk.bf16.mxu0 %vm3721_vm1, %v3720_v50 }
 0xf43   :  { %3281 = vmatprep.subr.bf16.mxu0 %v3720_v50 }
 0xf46   :  { %3282 = vmatpush3.bf16.msra.mxu0 %v3601_v52 }
 0xf49   :  { %3284 = vmatmul.mubr.msk.bf16.vlgmr.msra.gmra.mrb[20].mxu0 %vm240_vm0, %v1509_v21 }
0x1014   :  { %v4122_v19 = vpop.f32.mrb[16].mxu0 }
0x1015   :  { %v3277_v53 = vpop.f32.mrb[17].mxu0  ;;  %3291 = vmatprep.mubr.msk.f32.mxu1 %vm454_vm2, %v4122_v19 }
0x1016   :  { %v4126_v22 = vpop.f32.mrb[18].mxu0 }
0x1017   :  { %v3278_v23 = vpop.f32.mrb[19].mxu0  ;;  %v4130_v27 = vpack.i.bf16 %v4126_v22, %v4122_v19 }
0x1019   :  { %3543 = vrot.lane.b32.xlu0 %v4130_v27, %s3719_s16  ;;  %3538 = vrot.lane.b32.xlu1 %v4130_v27, %s3725_s27 }
0x101c   :  { %v1620_v60 = vpop.f32.mrb[20].mxu0 }
0x101d   :  { %2029 = vrot.lane.b32.xlu0 %v4122_v19, %s3722_s24  ;;  %1742 = vrot.lane.b32.xlu1 %v4122_v19, %s3726_s28  ;;  %v3285_v18 = vpop.f32.mrb[21].mxu0 }
0x101e   :  { %v1623_v16 = vpop.f32.mrb[22].mxu0 }
0x101f   :  { %v3286_v28 = vpop.f32.mrb[23].mxu0  ;;  %v4140_v36 = vpack.i.bf16 %v1623_v16, %v1620_v60  ;;  %v4142_v34 = vpack.c.bf16 %v1623_v16, %v1620_v60 }
0x1021   :  { %1744 = vrot.lane.b32.xlu1 %v4126_v22, %s3726_s28 }
0x1025   :  { %3548 = vrot.lane.b32.xlu1 %v4130_v27, %s3723_s25 }
0x1029   :  { %2031 = vrot.lane.b32.xlu1 %v4126_v22, %s3722_s24 }
0x108b   :  { %v3544_v30 = vpop.permute.xlu0 %3543  ;;  %v3539_v11 = vpop.permute.xlu1 %3538 }
0x108c   :  { %v3546_v12 = vunpack.i.h.bf16 %v3544_v30  ;;  %v3545_v32 = vunpack.i.l.bf16 %v3544_v30  ;;  %v3541_v37 = vunpack.i.h.bf16 %v3539_v11  ;;  %v3540_v39 = vunpack.i.l.bf16 %v3539_v11 }
0x108e   :  { %v3439_v41 = vpack.c.bf16 %v3546_v12, %v3545_v32  ;;  %v3445_v42 = vpack.c.bf16 %v3541_v37, %v3540_v39 }
0x108f   :  { %v1743_v43 = vpop.permute.xlu1 %1742  ;;  %v2030_v47 = vpop.permute.xlu0 %2029 }
0x1090   :  { %3441 = vmatprep.subr.msk.bf16.mxu1 %vm3928_vm3, %v3439_v41  ;;  %3447 = vmatprep.subr.msk.bf16.mxu0 %vm3928_vm3, %v3445_v42 }
0x1091   :  { %3298 = vmatprep.mubr.msk.f32.mxu0 %vm454_vm2, %v1743_v43  ;;  %3444 = vmatpush3.bf16.xpose.msk.msra.mxu1 %vm3928_vm3, %v3439_v41 }
0x1092   :  { %3450 = vmatpush3.bf16.xpose.msk.msra.mxu0 %vm3928_vm3, %v3445_v42 }
0x1093   :  { %v1745_v44 = vpop.permute.xlu1 %1744 }
0x1097   :  { %v3549_v45 = vpop.permute.xlu1 %3548 }
0x1098   :  { %v3551_v46 = vunpack.i.h.bf16 %v3549_v45  ;;  %v3550_v56 = vunpack.i.l.bf16 %v3549_v45  ;;  %3292 = vmatmul.mubr.msk.f32.vlgmr.msra.gmra.mrb[20].mxu1 %vm454_vm2, %v4126_v22 }
0x1099   :  { %3299 = vmatmul.mubr.msk.f32.vlgmr.msra.gmra.mrb[10].mxu0 %vm454_vm2, %v1745_v44 }
0x109a   :  { %v3459_v48 = vpack.c.bf16 %v3551_v46, %v3550_v56  ;;  %3319 = vmatprep.mubr.msk.f32.mxu0 %vm454_vm2, %v2030_v47 }
0x109b   :  { %v2032_v24 = vpop.permute.xlu1 %2031 }
0x109c   :  { %3461 = vmatprep.subr.msk.bf16.mxu0 %vm3928_vm3, %v3459_v48 }
0x109d   :  { %3464 = vmatpush3.bf16.xpose.msk.msra.mxu0 %vm3928_vm3, %v3459_v48 }
0x109e   :  { %3343 = vmatprep.subr.bf16.mxu0 %v3720_v50 }
0x10a4   :  { %3320 = vmatmul.mubr.msk.f32.vlgmr.msra.gmra.mrb[24].mxu0 %vm454_vm2, %v2032_v24 }
0x10a5   :  { %3347 = vmatprep.mubr.msk.bf16.mxu0 %vm3721_vm1, %v3720_v50 }
0x116b   :  { %v3293_v49 = vpop.f32.mrb[20].mxu1 }
0x116c   :  { %v3300_v54 = vpop.f32.mrb[10].mxu0  ;;  %v1707_v55 = vpop.f32.mrb[21].mxu1  ;;  %v1717_v4 = vmul.f32 0.35355338, %v3293_v49 }
0x116d   :  { %v1834_v57 = vmul.f32 0.35355338, %v3300_v54  ;;  %v1824_v58 = vpop.f32.mrb[11].mxu0  ;;  %v1716_v25 = vmul.f32 0.35355338, %v1707_v55 }
0x116e   :  { %v1833_v62 = vmul.f32 0.35355338, %v1824_v58  ;;  %v1719_v7 = vadd.f32 %v1717_v4, %v3937_v33 }
0x116f   :  { %v1836_v0 = vadd.f32 %v1834_v57, %v3937_v33  ;;  %v1718_v6 = vadd.f32 %v1716_v25, %v3939_v38 }
0x1170   :  { %v1835_v1 = vadd.f32 %v1833_v62, %v3939_v38  ;;  %v1723_v15 = vsel %vm548_vm4, %v1719_v7, -inf }
0x1171   :  { %v1840_v2 = vsel %vm548_vm4, %v1836_v0, -inf  ;;  %v1720_v26 = vsel %vm548_vm4, %v1718_v6, -inf }
0x1172   :  { %1841 = vmax.xlane.f32.xlu1 %v1840_v2  ;;  %v1837_v5 = vsel %vm548_vm4, %v1835_v1, -inf }
0x1173   :  { %1838 = vmax.xlane.f32.xlu0 %v1837_v5 }
0x1177   :  { %1721 = vmax.xlane.f32.xlu0 %v1720_v26  ;;  %v3321_v8 = vpop.f32.mrb[24].mxu0 }
0x1178   :  { %v2121_v10 = vmul.f32 0.35355338, %v3321_v8  ;;  %v2111_v13 = vpop.f32.mrb[25].mxu0 }
0x1179   :  { %v2120_v14 = vmul.f32 0.35355338, %v2111_v13 }
0x117a   :  { %v2123_v17 = vadd.f32 %v2121_v10, %v3937_v33 }
0x117b   :  { %1724 = vmax.xlane.f32.xlu0 %v1723_v15  ;;  %v2122_v21 = vadd.f32 %v2120_v14, %v3939_v38 }
0x117c   :  { %v2127_v52 = vsel %vm548_vm4, %v2123_v17, -inf }
0x117d   :  { %2128 = vmax.xlane.f32.xlu1 %v2127_v52  ;;  %v2124_v53 = vsel %vm548_vm4, %v2122_v21, -inf }
0x117f   :  { %2125 = vmax.xlane.f32.xlu0 %v2124_v53 }
0x11ff   :  { %v1842_v23 = vpop.xlane.xlu1 %1841 }
0x1200   :  { %v1844_v60 = vsub.f32 %v1836_v0, %v1842_v23  ;;  %v1839_v18 = vpop.xlane.xlu0 %1838 }
0x1201   :  { %v1843_v16 = vsub.f32 %v1835_v1, %v1839_v18 }
0x1202   :  { %v1847_v28 = vmul.f32 1.442695, %v1844_v60 }
0x1203   :  { %v1845_v30 = vmul.f32 1.442695, %v1843_v16 }
0x1204   :  { %3674 = vpow2.f32 %v1847_v28  ;;  %v1722_v11 = vpop.xlane.xlu0 %1721 }
0x1205   :  { %3676 = vpow2.f32 %v1845_v30  ;;  %v1726_v12 = vsub.f32 %v1718_v6, %v1722_v11 }
0x1207   :  { %v1728_v32 = vmul.f32 1.442695, %v1726_v12 }
0x1208   :  { %v1725_v37 = vpop.xlane.xlu0 %1724 }
0x1209   :  { %3678 = vpow2.f32 %v1728_v32  ;;  %v1727_v39 = vsub.f32 %v1719_v7, %v1725_v37 }
0x120a   :  { %v2129_v41 = vpop.xlane.xlu1 %2128 }
0x120b   :  { %v1730_v42 = vmul.f32 1.442695, %v1727_v39  ;;  %v2131_v43 = vsub.f32 %v2123_v17, %v2129_v41 }
0x120c   :  { %v2126_v44 = vpop.xlane.xlu0 %2125 }
0x120d   :  { %3680 = vpow2.f32 %v1730_v42  ;;  %v2134_v45 = vmul.f32 1.442695, %v2131_v43  ;;  %v2130_v46 = vsub.f32 %v2122_v21, %v2126_v44 }
0x120e   :  { %v3675_v56 = vpop.eup %3674 }
0x120f   :  { %v3677_v47 = vpop.eup %3676  ;;  %3682 = vpow2.f32 %v2134_v45  ;;  %v2132_v48 = vmul.f32 1.442695, %v2130_v46  ;;  %v1852_v24 = vsel %vm548_vm4, %v3675_v56, 0.0 }
0x1210   :  { %1853 = vadd.xlane.f32.xlu1 %v1852_v24  ;;  %v1849_v49 = vsel %vm548_vm4, %v3677_v47, 0.0 }
0x1211   :  { %3684 = vpow2.f32 %v2132_v48  ;;  %1850 = vadd.xlane.f32.xlu0 %v1849_v49 }
0x1213   :  { %v3679_v54 = vpop.eup %3678 }
0x1214   :  { %v1732_v55 = vsel %vm548_vm4, %v3679_v54, 0.0 }
0x1215   :  { %1733 = vadd.xlane.f32.xlu0 %v1732_v55 }
0x1217   :  { %v3681_v57 = vpop.eup %3680 }
0x1218   :  { %v1735_v58 = vsel %vm548_vm4, %v3681_v57, 0.0 }
0x1219   :  { %v3683_v25 = vpop.eup %3682  ;;  %1736 = vadd.xlane.f32.xlu1 %v1735_v58 }
0x121a   :  { %v2139_v62 = vsel %vm548_vm4, %v3683_v25, 0.0 }
0x121b   :  { %v3685_v0 = vpop.eup %3684 }
0x121c   :  { %v2136_v1 = vsel %vm548_vm4, %v3685_v0, 0.0 }
0x121d   :  { %2140 = vadd.xlane.f32.xlu1 %v2139_v62  ;;  %2137 = vadd.xlane.f32.xlu0 %v2136_v1 }
0x122e   :  { %3558 = vrot.lane.b32.xlu1 %v4140_v36, %s3724_s26 }
0x1232   :  { %3563 = vrot.lane.b32.xlu1 %v4130_v27, %s3728_s30 }
0x1233   :  { %3553 = vrot.lane.b32.xlu0 %v4140_v36, %s3719_s16 }
0x1236   :  { %2235 = vrot.lane.b32.xlu1 %v4122_v19, %s3727_s29 }
0x1237   :  { %2237 = vrot.lane.b32.xlu0 %v4126_v22, %s3727_s29 }
0x129d   :  { %v1854_v4 = vpop.xlane.xlu1 %1853 }
0x129e   :  { %v1851_v2 = vpop.xlane.xlu0 %1850 }
0x129f   :  { %3686 = vrcp.f32 %v1851_v2 }
0x12a0   :  { %3688 = vrcp.f32 %v1854_v4 }
0x12a2   :  { %v1734_v5 = vpop.xlane.xlu0 %1733 }
0x12a3   :  { %3690 = vrcp.f32 %v1734_v5 }
0x12a6   :  { %v1737_v6 = vpop.xlane.xlu1 %1736 }
0x12a7   :  { %3692 = vrcp.f32 %v1737_v6 }
0x12a9   :  { %v3687_v26 = vpop.eup %3686 }
0x12aa   :  { %v2141_v7 = vpop.xlane.xlu1 %2140  ;;  %v2138_v8 = vpop.xlane.xlu0 %2137  ;;  %v1857_v27 = vmul.f32 %v3687_v26, %v3677_v47 }
0x12ab   :  { %3694 = vrcp.f32 %v2138_v8  ;;  %v3689_v15 = vpop.eup %3688 }
0x12ac   :  { %3305 = vmatprep.mubr.msk.f32.mxu1 %vm548_vm4, %v1857_v27  ;;  %v1858_v53 = vmul.f32 %v3689_v15, %v3675_v56  ;;  %3696 = vrcp.f32 %v2141_v7 }
0x12ad   :  { %v3691_v17 = vpop.eup %3690 }
0x12ae   :  { %v3554_v10 = vpop.permute.xlu0 %3553  ;;  %v3559_v19 = vpop.permute.xlu1 %3558  ;;  %v1740_v23 = vmul.f32 %v3691_v17, %v3679_v54 }
0x12af   :  { %v3556_v13 = vunpack.i.h.bf16 %v3554_v10  ;;  %v3555_v14 = vunpack.i.l.bf16 %v3554_v10  ;;  %v3561_v21 = vunpack.i.h.bf16 %v3559_v19  ;;  %v3560_v52 = vunpack.i.l.bf16 %v3559_v19 }
0x12b0   :  { %v2446_v10 = vrot.slane %v4103_v3, %v276_v20 }
0x12b1   :  { %v3451_v22 = vpack.c.bf16 %v3556_v13, %v3555_v14  ;;  %v3465_v60 = vpack.c.bf16 %v3561_v21, %v3560_v52  ;;  %v3693_v16 = vpop.eup %3692 }
0x12b2   :  { %v3564_v18 = vpop.permute.xlu1 %3563  ;;  %v1741_v12 = vmul.f32 %v3693_v16, %v3681_v57  ;;  %v2238_v42 = vpop.permute.xlu0 %2237 }
0x12b3   :  { %3452 = vmatprep.subr.bf16.mxu1 %v3451_v22  ;;  %v3566_v30 = vunpack.i.h.bf16 %v3564_v18  ;;  %v3565_v11 = vunpack.i.l.bf16 %v3564_v18 }
0x12b4   :  { %3454 = vmatpush3.bf16.msra.mxu1 %v3451_v22 }
0x12b5   :  { %3456 = vmatprep.subr.bf16.mxu1 %v4142_v34  ;;  %v3695_v28 = vpop.eup %3694  ;;  %v3469_v37 = vpack.c.bf16 %v3566_v30, %v3565_v11  ;;  %v3602_v30 = vld [vmem:[%s4350_s3 + $0x50] sm:$0xff]   ;;  %v3603_v11 = vld [vmem:[%s4350_s3 + $0x58] sm:$0xff]  }
0x12b6   :  { %v2144_v32 = vmul.f32 %v3695_v28, %v3685_v0  ;;  %v3697_v39 = vpop.eup %3696  ;;  %v2236_v41 = vpop.permute.xlu1 %2235  ;;  %3344 = vmatpush3.bf16.msra.mxu0 %v3602_v30 }
0x12b7   :  { %3306 = vmatmul.mubr.msk.f32.vlgmr.msra.gmra.mrb[22].mxu1 %vm548_vm4, %v1858_v53  ;;  %3345 = vmatprep.subr.bf16.mxu0 %v3720_v50 }
0x12b8   :  { %3458 = vmatpush3.bf16.msra.mxu1 %v4142_v34  ;;  %3312 = vmatprep.mubr.msk.f32.mxu1 %vm548_vm4, %v1740_v23  ;;  %v2145_v34 = vmul.f32 %v3697_v39, %v3683_v25 }
0x12b9   :  { %3466 = vmatprep.subr.bf16.mxu1 %v3465_v60 }
0x12ba   :  { %3346 = vmatpush3.bf16.msra.mxu0 %v3603_v11 }
0x12bb   :  { %3351 = vmatprep.subr.bf16.mxu0 %v3720_v50 }
0x12bf   :  { %3313 = vmatmul.mubr.msk.f32.vlgmr.msra.gmra.mrb[22].mxu1 %vm548_vm4, %v1741_v12 }
0x12c0   :  { %3468 = vmatpush3.bf16.msra.mxu1 %v3465_v60  ;;  %3326 = vmatprep.mubr.msk.f32.mxu1 %vm548_vm4, %v2144_v32 }
0x12c1   :  { %3471 = vmatprep.subr.msk.bf16.mxu1 %vm3928_vm3, %v3469_v37 }
0x12c7   :  { %3327 = vmatmul.mubr.msk.f32.vlgmr.msra.gmra.mrb[22].mxu1 %vm548_vm4, %v2145_v34 }
0x12c8   :  { %3333 = vmatprep.mubr.msk.f32.mxu1 %vm454_vm2, %v2236_v41 }
0x12c9   :  { %3474 = vmatpush3.bf16.xpose.msk.msra.mxu1 %vm3928_vm3, %v3469_v37 }
0x12d0   :  { %3334 = vmatmul.mubr.msk.f32.vlgmr.msra.gmra.mrb[24].mxu1 %vm454_vm2, %v2238_v42 }
0x13a3   :  { %v3335_v43 = vpop.f32.mrb[24].mxu1 }
0x13a4   :  { %v2327_v44 = vmul.f32 0.35355338, %v3335_v43  ;;  %v2317_v45 = vpop.f32.mrb[25].mxu1 }
0x13a5   :  { %v2326_v46 = vmul.f32 0.35355338, %v2317_v45 }
0x13a6   :  { %v2329_v56 = vadd.f32 %v2327_v44, %v3937_v33 }
0x13a7   :  { %v2328_v47 = vadd.f32 %v2326_v46, %v3939_v38 }
0x13a8   :  { %v2333_v48 = vsel %vm548_vm4, %v2329_v56, -inf }
0x13a9   :  { %2334 = vmax.xlane.f32.xlu0 %v2333_v48  ;;  %v2330_v24 = vsel %vm548_vm4, %v2328_v47, -inf  ;;  %v3606_v48 = vld [vmem:[%s4351_s4 + $0x30] sm:$0xff]  }
0x13aa   :  { %2331 = vmax.xlane.f32.xlu1 %v2330_v24  ;;  %v3607_v24 = vld [vmem:[%s4351_s4 + $0x38] sm:$0xff]  }
0x13bb   :  { %3568 = vrot.lane.b32.xlu1 %v4140_v36, %s3729_s7 }
0x1436   :  { %v2335_v31 = vpop.xlane.xlu0 %2334 }
0x1437   :  { %v2337_v49 = vsub.f32 %v2329_v56, %v2335_v31  ;;  %v2332_v54 = vpop.xlane.xlu1 %2331  ;;  %v3604_v56 = vld [vmem:[%s4351_s4 + $0x20] sm:$0xff]   ;;  %v2483_v31 = vrot.slane %v4103_v3, %v320_v61 }
0x1438   :  { %v2336_v55 = vsub.f32 %v2328_v47, %v2332_v54  ;;  %v3605_v47 = vld [vmem:[%s4351_s4 + $0x28] sm:$0xff]  }
0x1439   :  { %v2340_v57 = vmul.f32 1.442695, %v2337_v49 }
0x143a   :  { %v2338_v58 = vmul.f32 1.442695, %v2336_v55 }
0x143b   :  { %v3569_v25 = vpop.permute.xlu1 %3568 }
0x143c   :  { %3698 = vpow2.f32 %v2338_v58  ;;  %v3571_v33 = vunpack.i.h.bf16 %v3569_v25  ;;  %v3570_v62 = vunpack.i.l.bf16 %v3569_v25 }
0x143d   :  { %3700 = vpow2.f32 %v2340_v57 }
0x143e   :  { %v3475_v38 = vpack.c.bf16 %v3571_v33, %v3570_v62 }
0x1440   :  { %3476 = vmatprep.subr.bf16.mxu1 %v3475_v38 }
0x1441   :  { %3478 = vmatpush3.bf16.msra.mxu1 %v3475_v38 }
0x1442   :  { %3363 = vmatprep.subr.bf16.mxu1 %v3720_v50 }
0x1446   :  { %v3699_v0 = vpop.eup %3698 }
0x1447   :  { %v2342_v1 = vsel %vm548_vm4, %v3699_v0, 0.0  ;;  %v3701_v36 = vpop.eup %3700 }
0x1448   :  { %2343 = vadd.xlane.f32.xlu0 %v2342_v1  ;;  %v2345_v2 = vsel %vm548_vm4, %v3701_v36, 0.0 }
0x144c   :  { %2346 = vadd.xlane.f32.xlu0 %v2345_v2 }
0x14d5   :  { %v2344_v4 = vpop.xlane.xlu0 %2343 }
0x14d6   :  { %3702 = vrcp.f32 %v2344_v4 }
0x14d9   :  { %v2347_v5 = vpop.xlane.xlu0 %2346 }
0x14da   :  { %3704 = vrcp.f32 %v2347_v5 }
0x14e0   :  { %v3703_v6 = vpop.eup %3702 }
0x14e1   :  { %v2350_v26 = vmul.f32 %v3703_v6, %v3699_v0 }
0x14e3   :  { %3340 = vmatprep.mubr.msk.f32.mxu1 %vm548_vm4, %v2350_v26 }
0x14e4   :  { %v3705_v7 = vpop.eup %3704 }
0x14e5   :  { %v2351_v8 = vmul.f32 %v3705_v7, %v3701_v36 }
0x14e7   :  { %3341 = vmatmul.mubr.msk.f32.vlgmr.msra.gmra.mrb[22].mxu1 %vm548_vm4, %v2351_v8 }
0x14e8   :  { %3367 = vmatprep.mubr.msk.bf16.mxu1 %vm3721_vm1, %v3720_v50 }
0x15ba   :  { %v3342_v27 = vpop.f32.mrb[22].mxu1 }
0x15bb   :  { %v2430_v13 = vpop.f32.mrb[23].mxu1  ;;  %v2442_v14 = vadd.f32 %v3342_v27, %v4082_v40 }
0x15bc   :  { %v2441_v19 = vadd.f32 %v2430_v13, %v4079_v35 }
0x15bd   :  { %v4233_v15 = vadd.f32 %v2446_v10, %v2442_v14 }
0x15be   :  { %v4231_v22 = vadd.f32 %v2446_v10, %v2441_v19 }
0x15bf   :  { %v2452_v21 = vsel %vm240_vm0, %v4233_v15, 0.0 }
0x15c0   :  { %v2449_v17 = vsel %vm240_vm0, %v4231_v22, 0.0 }
0x15c1   :  { %2450 = vadd.xlane.f32.xlu0 %v2449_v17  ;;  %v2570_v17 = vrot.slane %v4103_v3, %v326_v63 }
0x15c5   :  { %2453 = vadd.xlane.f32.xlu0 %v2452_v21 }
0x164e   :  { %v2451_v52 = vpop.xlane.xlu0 %2450 }
0x164f   :  { %v2455_v53 = vmul.f32 0.03125, %v2451_v52 }
0x1651   :  { %v2457_v20 = vsub.f32 %v4231_v22, %v2455_v53 }
0x1652   :  { %v2454_v23 = vpop.xlane.xlu0 %2453 }
0x1653   :  { %v2456_v40 = vmul.f32 0.03125, %v2454_v23  ;;  %v2459_v60 = vmul.f32 %v2457_v20, %v2457_v20 }
0x1655   :  { %v2458_v35 = vsub.f32 %v4233_v15, %v2456_v40  ;;  %v2461_v18 = vsel %vm240_vm0, %v2459_v60, 0.0 }
0x1656   :  { %2462 = vadd.xlane.f32.xlu0 %v2461_v18 }
0x1657   :  { %v2460_v16 = vmul.f32 %v2458_v35, %v2458_v35 }
0x1659   :  { %v2464_v28 = vsel %vm240_vm0, %v2460_v16, 0.0 }
0x165a   :  { %2465 = vadd.xlane.f32.xlu0 %v2464_v28 }
0x16e3   :  { %v2463_v12 = vpop.xlane.xlu0 %2462 }
0x16e4   :  { %v2467_v32 = vmul.f32 0.03125, %v2463_v12 }
0x16e6   :  { %v2469_v37 = vadd.f32 1e-05, %v2467_v32 }
0x16e7   :  { %v2466_v39 = vpop.xlane.xlu0 %2465 }
0x16e8   :  { %v2468_v34 = vmul.f32 0.03125, %v2466_v39  ;;  %3706 = vrsqrt.f32 %v2469_v37 }
0x16ea   :  { %v2470_v41 = vadd.f32 1e-05, %v2468_v34 }
0x16ec   :  { %3708 = vrsqrt.f32 %v2470_v41  ;;  %v3609_v41 = vld [vmem:[%s4350_s3 + $0x68] sm:$0xff]  }
0x16f2   :  { %v3707_v42 = vpop.eup %3706 }
0x16f3   :  { %v2473_v44 = vmul.f32 %v3707_v42, %v2457_v20 }
0x16f6   :  { %v3709_v43 = vpop.eup %3708 }
0x16f7   :  { %v2474_v45 = vmul.f32 %v3709_v43, %v2458_v35 }
0x16f9   :  { %v2475_v46 = vpack.c.bf16 %v2474_v45, %v2473_v44 }
0x16fb   :  { %3348 = vmatmul.mubr.msk.bf16.vlgmr.msra.gmra.mrb[28].mxu0 %vm240_vm0, %v2475_v46 }
0x16fc   :  { %3359 = vmatprep.mubr.msk.bf16.mxu0 %vm3721_vm1, %v3720_v50  ;;  %3352 = vmatpush3.bf16.msra.mxu0 %v3604_v56 }
0x16fd   :  { %3353 = vmatprep.subr.bf16.mxu0 %v3720_v50 }
0x1700   :  { %3354 = vmatpush3.bf16.msra.mxu0 %v3605_v47 }
0x1701   :  { %3355 = vmatprep.subr.bf16.mxu0 %v3720_v50 }
0x1704   :  { %3356 = vmatpush3.bf16.msra.mxu0 %v3606_v48 }
0x1705   :  { %3357 = vmatprep.subr.bf16.mxu0 %v3720_v50 }
0x1708   :  { %3358 = vmatpush3.bf16.msra.mxu0 %v3607_v24 }
0x1709   :  { %3379 = vmatprep.subr.bf16.mxu0 %v3720_v50 }
0x17ce   :  { %v2533_v49 = vpop.f32.mrb[28].mxu0 }
0x17cf   :  { %v2534_v54 = vadd.f32 %v2533_v49, %v2483_v31  ;;  %v3349_v55 = vpop.f32.mrb[29].mxu0 }
0x17d0   :  { %v2536_v57 = vpop.f32.mrb[30].mxu0  ;;  %v3611_v55 = vld [vmem:[%s4350_s3 + $0x80] sm:$0xff]  }
0x17d1   :  { %v2542_v58 = vmul.f32 0.044715, %v2534_v54  ;;  %v2537_v25 = vadd.f32 %v2536_v57, %v2483_v31  ;;  %v3350_v33 = vpop.f32.mrb[31].mxu0  ;;  %v2540_v8 = vmul.f32 0.5, %v2534_v54  ;;  %v3612_v57 = vld [vmem:[%s4350_s3 + $0x78] sm:$0xff]  }
0x17d3   :  { %v2544_v62 = vmul.f32 %v2542_v58, %v2534_v54  ;;  %v2543_v38 = vmul.f32 0.044715, %v2537_v25  ;;  %v2541_v27 = vmul.f32 0.5, %v2537_v25  ;;  %v3613_v58 = vld [vmem:[%s4350_s3 + $0x88] sm:$0xff]  }
0x17d5   :  { %v2546_v0 = vmul.f32 %v2544_v62, %v2534_v54  ;;  %v2545_v1 = vmul.f32 %v2543_v38, %v2537_v25 }
0x17d7   :  { %v2548_v36 = vadd.f32 %v2546_v0, %v2534_v54  ;;  %v2547_v2 = vmul.f32 %v2545_v1, %v2537_v25  ;;  %v3610_v54 = vld [vmem:[%s4350_s3 + $0x70] sm:$0xff]  }
0x17d9   :  { %v2550_v4 = vmul.f32 0.7978846, %v2548_v36  ;;  %v2549_v5 = vadd.f32 %v2547_v2, %v2537_v25  ;;  %v2675_v25 = vrot.slane %v4103_v3, %v1274_v9  ;;  %v3614_v2 = vld [vmem:[%s4351_s4 + $0x40] sm:$0xff]   ;;  %v3615_v9 = vld [vmem:[%s4351_s4 + $0x48] sm:$0xff]  }
0x17db   :  { %3710 = vtanh.f32 %v2550_v4  ;;  %v2551_v6 = vmul.f32 0.7978846, %v2549_v5  ;;  %v3616_v5 = vld [vmem:[%s4351_s4 + $0x50] sm:$0xff]  }
0x17dd   :  { %3712 = vtanh.f32 %v2551_v6  ;;  %v3617_v6 = vld [vmem:[%s4351_s4 + $0x58] sm:$0xff]  }
0x17e5   :  { %v3711_v26 = vpop.eup %3710 }
0x17e6   :  { %v2554_v61 = vadd.f32 1.0, %v3711_v26  ;;  %v2740_v26 = vrot.slane %v4103_v3, %v1311_v59 }
0x17e7   :  { %v3713_v7 = vpop.eup %3712 }
0x17e8   :  { %v2555_v10 = vadd.f32 1.0, %v3713_v7  ;;  %v2556_v13 = vmul.f32 %v2554_v61, %v2540_v8 }
0x17ea   :  { %v2557_v14 = vmul.f32 %v2555_v10, %v2541_v27 }
0x17ec   :  { %v2558_v19 = vpack.c.bf16 %v2557_v14, %v2556_v13 }
0x17ee   :  { %3360 = vmatmul.mubr.msk.bf16.vlgmr.msra.gmra.mrb[32].mxu0 %vm1424_vm5, %v2558_v19 }
0x17ef   :  { %3383 = vmatprep.mubr.msk.bf16.mxu0 %vm3721_vm1, %v3720_v50  ;;  %3380 = vmatpush3.bf16.msra.mxu0 %v3611_v55 }
0x17f0   :  { %3381 = vmatprep.subr.bf16.mxu0 %v3720_v50 }
0x17f3   :  { %3382 = vmatpush3.bf16.msra.mxu0 %v3613_v58 }
0x18c1   :  { %v2632_v21 = vpop.f32.mrb[32].mxu0 }
0x18c2   :  { %v2633_v52 = vadd.f32 %v2632_v21, %v2570_v17  ;;  %v3361_v53 = vpop.f32.mrb[33].mxu0 }
0x18c3   :  { %v2635_v20 = vpop.f32.mrb[34].mxu0 }
0x18c4   :  { %v2636_v23 = vadd.f32 %v2635_v20, %v2570_v17  ;;  %v3362_v40 = vpop.f32.mrb[35].mxu0  ;;  %v2639_v60 = vadd.f32 %v2633_v52, %v4231_v22  ;;  %v2936_v20 = vrot.slane %v4103_v3, %v1398_v29 }
0x18c6   :  { %v2641_v35 = vsel %vm240_vm0, %v2639_v60, 0.0  ;;  %v2640_v18 = vadd.f32 %v2636_v23, %v4233_v15  ;;  %v3608_v15 = vld [vmem:[%s4350_s3 + $0x60] sm:$0xff]  }
0x18c7   :  { %2642 = vadd.xlane.f32.xlu1 %v2641_v35  ;;  %3364 = vmatpush3.bf16.msra.mxu1 %v3608_v15 }
0x18c8   :  { %v2644_v16 = vsel %vm240_vm0, %v2640_v18, 0.0  ;;  %3365 = vmatprep.subr.bf16.mxu1 %v3720_v50 }
0x18c9   :  { %2645 = vadd.xlane.f32.xlu0 %v2644_v16 }
0x18cb   :  { %3366 = vmatpush3.bf16.msra.mxu1 %v3609_v41 }
0x18cc   :  { %3371 = vmatprep.subr.bf16.mxu1 %v3720_v50 }
0x1954   :  { %v2643_v28 = vpop.xlane.xlu1 %2642 }
0x1955   :  { %v2647_v30 = vmul.f32 0.03125, %v2643_v28 }
0x1956   :  { %v2646_v11 = vpop.xlane.xlu0 %2645 }
0x1957   :  { %v2649_v63 = vsub.f32 %v2639_v60, %v2647_v30  ;;  %v2648_v12 = vmul.f32 0.03125, %v2646_v11 }
0x1959   :  { %v2650_v32 = vsub.f32 %v2640_v18, %v2648_v12  ;;  %v2651_v37 = vmul.f32 %v2649_v63, %v2649_v63 }
0x195b   :  { %v2653_v39 = vsel %vm240_vm0, %v2651_v37, 0.0  ;;  %v2652_v34 = vmul.f32 %v2650_v32, %v2650_v32 }
0x195c   :  { %2654 = vadd.xlane.f32.xlu0 %v2653_v39 }
0x195d   :  { %v2656_v22 = vsel %vm240_vm0, %v2652_v34, 0.0 }
0x1960   :  { %2657 = vadd.xlane.f32.xlu0 %v2656_v22 }
0x19e9   :  { %v2655_v42 = vpop.xlane.xlu0 %2654 }
0x19ea   :  { %v2659_v43 = vmul.f32 0.03125, %v2655_v42 }
0x19ec   :  { %v2661_v44 = vadd.f32 1e-05, %v2659_v43 }
0x19ed   :  { %v2658_v45 = vpop.xlane.xlu0 %2657 }
0x19ee   :  { %v2660_v46 = vmul.f32 0.03125, %v2658_v45  ;;  %3714 = vrsqrt.f32 %v2661_v44 }
0x19f0   :  { %v2662_v56 = vadd.f32 1e-05, %v2660_v46 }
0x19f2   :  { %3716 = vrsqrt.f32 %v2662_v56 }
0x19f8   :  { %v3715_v47 = vpop.eup %3714 }
0x19f9   :  { %v2665_v24 = vmul.f32 %v3715_v47, %v2649_v63 }
0x19fc   :  { %v3717_v48 = vpop.eup %3716 }
0x19fd   :  { %v2666_v31 = vmul.f32 %v3717_v48, %v2650_v32 }
0x19ff   :  { %v2667_v49 = vpack.c.bf16 %v2666_v31, %v2665_v24 }
0x1a01   :  { %3368 = vmatmul.mubr.msk.bf16.vlgmr.msra.gmra.mrb[28].mxu1 %vm240_vm0, %v2667_v49 }
0x1a02   :  { %3375 = vmatprep.mubr.msk.bf16.mxu1 %vm3721_vm1, %v3720_v50  ;;  %3372 = vmatpush3.bf16.msra.mxu1 %v3610_v54 }
0x1a03   :  { %3373 = vmatprep.subr.bf16.mxu1 %v3720_v50 }
0x1a06   :  { %3374 = vmatpush3.bf16.msra.mxu1 %v3612_v57 }
0x1a07   :  { %3387 = vmatprep.subr.bf16.mxu1 %v3720_v50 }
0x1ad4   :  { %v2725_v33 = vpop.f32.mrb[28].mxu1 }
0x1ad5   :  { %v3369_v62 = vpop.f32.mrb[29].mxu1  ;;  %v2726_v0 = vadd.f32 %v2725_v33, %v2675_v25 }
0x1ad6   :  { %v2728_v38 = vpop.f32.mrb[30].mxu1 }
0x1ad7   :  { %v2729_v1 = vadd.f32 %v2728_v38, %v2675_v25  ;;  %v3370_v36 = vpop.f32.mrb[31].mxu1 }
0x1ad9   :  { %v2732_v4 = vpack.c.bf16 %v2729_v1, %v2726_v0 }
0x1adb   :  { %3376 = vmatmul.mubr.msk.bf16.vlgmr.msra.gmra.mrb[32].mxu1 %vm240_vm0, %v2732_v4  ;;  %3384 = vmatmul.mubr.msk.bf16.vlgmr.msra.gmra.mrb[36].mxu0 %vm240_vm0, %v2732_v4 }
0x1adc   :  { %3388 = vmatpush3.bf16.msra.mxu1 %v3614_v2  ;;  %3395 = vmatprep.mubr.msk.bf16.mxu1 %vm3721_vm1, %v3720_v50 }
0x1add   :  { %3389 = vmatprep.subr.bf16.mxu1 %v3720_v50 }
0x1ae0   :  { %3390 = vmatpush3.bf16.msra.mxu1 %v3615_v9 }
0x1ae1   :  { %3391 = vmatprep.subr.bf16.mxu1 %v3720_v50 }
0x1ae4   :  { %3392 = vmatpush3.bf16.msra.mxu1 %v3616_v5 }
0x1ae5   :  { %3393 = vmatprep.subr.bf16.mxu1 %v3720_v50 }
0x1ae8   :  { %3394 = vmatpush3.bf16.msra.mxu1 %v3617_v6 }
0x1bae   :  { %v2790_v61 = vpop.f32.mrb[32].mxu1  ;;  %v2858_v7 = vpop.f32.mrb[36].mxu0 }
0x1baf   :  { %v2791_v8 = vadd.f32 %v2790_v61, %v2740_v26  ;;  %v3377_v27 = vpop.f32.mrb[33].mxu1  ;;  %v3385_v10 = vpop.f32.mrb[37].mxu0 }
0x1bb0   :  { %v2793_v13 = vpop.f32.mrb[34].mxu1  ;;  %v2861_v14 = vpop.f32.mrb[38].mxu0 }
0x1bb1   :  { %v2794_v19 = vadd.f32 %v2793_v13, %v2740_v26  ;;  %v3378_v17 = vpop.f32.mrb[35].mxu1  ;;  %v3386_v21 = vpop.f32.mrb[39].mxu0  ;;  %v2797_v50 = vmax.f32 %v2791_v8, 0.0 }
0x1bb3   :  { %v2798_v52 = vmax.f32 %v2794_v19, 0.0 }
0x1bb5   :  { %v2799_v53 = vpack.c.bf16 %v2798_v52, %v2797_v50 }
0x1bb7   :  { %3396 = vmatmul.mubr.msk.bf16.vlgmr.msra.gmra.mrb[36].mxu1 %vm1424_vm5, %v2799_v53 }
0x1c8a   :  { %v2926_v59 = vpop.f32.mrb[36].mxu1 }
0x1c8b   :  { %v2927_v23 = vadd.f32 %v2926_v59, %v2858_v7  ;;  %v3397_v40 = vpop.f32.mrb[37].mxu1 }
0x1c8c   :  { %v2929_v60 = vpop.f32.mrb[38].mxu1 }
0x1c8d   :  { %v2937_v35 = vadd.f32 %v2936_v20, %v2927_v23  ;;  %v2930_v18 = vadd.f32 %v2929_v60, %v2861_v14  ;;  %v3398_v16 = vpop.f32.mrb[39].mxu1 }
0x1c8f   :  { %2939 = vst [vmem:[%s4352_s6] sm:$0xff] %v2937_v35  ;;  %v2938_v28 = vadd.f32 %v2936_v20, %v2930_v18 }
0x1c91   :  { %2940 = vst [vmem:[%s4352_s6 + $0x8] sm:$0xff] %v2938_v28 }

</bundles_post_ra>
